<compile_context>
chip_gen: v6e
topology: v6e:2x2x1
jax: 0.10.0
libtpu: 0.0.40
codegen_flags: <defaults>
</compile_context>

<pallas_src>
import functools

import jax
import jax.numpy as jnp
from jax import lax
from jax.experimental import pallas as pl
from jax.experimental.pallas import tpu as pltpu


def _lstm_kernel(*refs, n_layers, seq_len, hidden_dim, matmul_dtype):
    # refs = (x, [wih_l, whh_l, b_l] * n_layers, wfc, bfc,   # inputs
    #         out, h_n, c_n,                                  # outputs
    #         seq_buf, gates_buf)                             # scratch
    n_in = 1 + 3 * n_layers + 2
    in_refs = refs[:n_in]
    out_ref, hn_ref, cn_ref = refs[n_in:n_in + 3]
    seq_buf, gates_buf = refs[n_in + 3:n_in + 5]

    x_ref = in_refs[0]
    layer_refs = in_refs[1:1 + 3 * n_layers]
    wfc_ref, bfc_ref = in_refs[1 + 3 * n_layers:]

    T = seq_len
    H = hidden_dim
    B = x_ref.shape[1]  # batch tile (sublane-dense, padded to 8 in wrapper)
    mm = matmul_dtype

    # small T -> full unroll for LLO visibility; otherwise modest unroll window
    unroll = True if T <= 16 else 4

    for l in range(n_layers):
        wih = layer_refs[3 * l][...].astype(mm)       # (D_l, 4H)
        whh = layer_refs[3 * l + 1][...].astype(mm)   # (H,   4H)
        b = layer_refs[3 * l + 2][...]                # (1,   4H) == b_ih + b_hh

        # ---- hoisted input projection over all timesteps (one big matmul) ----
        inp = x_ref[...] if l == 0 else seq_buf[...]  # (T, B, D_l), f32
        d_l = inp.shape[-1]
        xproj = jnp.dot(inp.reshape(T * B, d_l).astype(mm), wih,
                        preferred_element_type=jnp.float32) + b   # (T*B, 4H) f32
        gates_buf[...] = xproj.reshape(T, B, 4 * H)

        def step(t, carry, whh=whh):
            h, c = carry
            # only the recurrent matmul stays on the serial critical path
            gates = gates_buf[t] + jnp.dot(h.astype(mm), whh,
                                           preferred_element_type=jnp.float32)
            # two full-width EUP passes over the (B, 4H) tile, then slice gates
            sig = jax.nn.sigmoid(gates)
            th = jnp.tanh(gates)
            i_g = sig[:, 0 * H:1 * H]
            f_g = sig[:, 1 * H:2 * H]
            g_g = th[:, 2 * H:3 * H]
            o_g = sig[:, 3 * H:4 * H]
            c = f_g * c + i_g * g_g
            h = o_g * jnp.tanh(c)
            seq_buf[t] = h  # layer output at time t
            return (h, c)

        h0 = jnp.zeros((B, H), jnp.float32)
        c0 = jnp.zeros((B, H), jnp.float32)
        h, c = lax.fori_loop(0, T, step, (h0, c0), unroll=unroll)

        hn_ref[l] = h
        cn_ref[l] = c

    # Final fully-connected layer: single clean 2-D matmul over all T*B rows.
    hs = seq_buf[...].reshape(T * B, H).astype(mm)
    wfc = wfc_ref[...].astype(mm)                     # (H, O)
    out = jnp.dot(hs, wfc, preferred_element_type=jnp.float32) + bfc_ref[...]
    out_ref[...] = out.reshape(T, B, out.shape[-1])


def lstm_forward(x, params, *, hidden_dim, n_layers, output_size,
                 batch_tile=8, matmul_dtype=jnp.float32):
    """x: (B, T, input_size) float32 (PyTorch batch_first layout).

    matmul_dtype: set to jnp.bfloat16 on v6e/v7x for large H to double MXU
    throughput (cell state / accumulation stay f32). Default f32 for exactness.
    """
    B, T, D = x.shape
    H = hidden_dim
    O = output_size

    # time-major + pad batch to a sublane-dense multiple of batch_tile (8 f32)
    B_pad = ((B + batch_tile - 1) // batch_tile) * batch_tile
    x_tm = jnp.transpose(x, (1, 0, 2)).astype(jnp.float32)  # (T, B, D)
    if B_pad != B:
        x_tm = jnp.pad(x_tm, ((0, 0), (0, B_pad - B), (0, 0)))

    kernel_inputs = [x_tm]
    in_specs = [pl.BlockSpec((T, batch_tile, D), lambda b: (0, b, 0))]
    for l in range(n_layers):
        w_ih, w_hh, b_ih, b_hh = params["layers"][l]
        d_l = D if l == 0 else H
        kernel_inputs.append(jnp.transpose(w_ih))               # (D_l, 4H)
        kernel_inputs.append(jnp.transpose(w_hh))               # (H,   4H)
        kernel_inputs.append((b_ih + b_hh).reshape(1, 4 * H))   # (1,   4H)
        in_specs.append(pl.BlockSpec((d_l, 4 * H), lambda b: (0, 0)))
        in_specs.append(pl.BlockSpec((H, 4 * H), lambda b: (0, 0)))
        in_specs.append(pl.BlockSpec((1, 4 * H), lambda b: (0, 0)))
    w_fc, b_fc = params["fc"]
    kernel_inputs.append(jnp.transpose(w_fc))                   # (H, O)
    kernel_inputs.append(b_fc.reshape(1, O))                    # (1, O)
    in_specs.append(pl.BlockSpec((H, O), lambda b: (0, 0)))
    in_specs.append(pl.BlockSpec((1, O), lambda b: (0, 0)))

    kernel = functools.partial(
        _lstm_kernel, n_layers=n_layers, seq_len=T, hidden_dim=H,
        matmul_dtype=matmul_dtype,
    )

    grid = (B_pad // batch_tile,)
    out_tm, h_n, c_n = pl.pallas_call(
        kernel,
        out_shape=(
            jax.ShapeDtypeStruct((T, B_pad, O), jnp.float32),
            jax.ShapeDtypeStruct((n_layers, B_pad, H), jnp.float32),
            jax.ShapeDtypeStruct((n_layers, B_pad, H), jnp.float32),
        ),
        grid_spec=pltpu.PrefetchScalarGridSpec(
            num_scalar_prefetch=0,
            grid=grid,
            in_specs=in_specs,
            out_specs=(
                pl.BlockSpec((T, batch_tile, O), lambda b: (0, b, 0)),
                pl.BlockSpec((n_layers, batch_tile, H), lambda b: (0, b, 0)),
                pl.BlockSpec((n_layers, batch_tile, H), lambda b: (0, b, 0)),
            ),
            scratch_shapes=[
                pltpu.VMEM((T, batch_tile, H), jnp.float32),       # layer outputs
                pltpu.VMEM((T, batch_tile, 4 * H), jnp.float32),   # hoisted x-proj
            ],
        ),
        compiler_params=pltpu.CompilerParams(
            dimension_semantics=("parallel",)),   # batch tiles -> both TCs on v7x
    )(*kernel_inputs)

    # drop batch padding, back to (B, T, O)
    out = jnp.transpose(out_tm[:, :B, :], (1, 0, 2))
    return out, (h_n[:, :B, :], c_n[:, :B, :])


def init_params(key, input_size, hidden_dim, n_layers, output_size):
    """Deterministic init mirroring PyTorch shapes: W_ih (4H, D_l), W_hh (4H, H)."""
    H = hidden_dim
    scale = 1.0 / jnp.sqrt(jnp.float32(H))
    layers = []
    for l in range(n_layers):
        d_l = input_size if l == 0 else H
        key, k1, k2, k3, k4 = jax.random.split(key, 5)
        w_ih = jax.random.uniform(k1, (4 * H, d_l), jnp.float32, -scale, scale)
        w_hh = jax.random.uniform(k2, (4 * H, H), jnp.float32, -scale, scale)
        b_ih = jax.random.uniform(k3, (4 * H,), jnp.float32, -scale, scale)
        b_hh = jax.random.uniform(k4, (4 * H,), jnp.float32, -scale, scale)
        layers.append((w_ih, w_hh, b_ih, b_hh))
    key, k1, k2 = jax.random.split(key, 3)
    w_fc = jax.random.uniform(k1, (output_size, H), jnp.float32, -scale, scale)
    b_fc = jax.random.uniform(k2, (output_size,), jnp.float32, -scale, scale)
    return {"layers": layers, "fc": (w_fc, b_fc)}


def lstm_reference(x, params, *, hidden_dim, n_layers):
    """Pure-JAX reference for a sanity check of the Pallas kernel."""
    B, T, _ = x.shape
    H = hidden_dim
    h_n, c_n = [], []
    layer_in = x
    for l in range(n_layers):
        w_ih, w_hh, b_ih, b_hh = params["layers"][l]
        h = jnp.zeros((B, H), jnp.float32)
        c = jnp.zeros((B, H), jnp.float32)
        outs = []
        for t in range(T):
            g = layer_in[:, t, :] @ w_ih.T + b_ih + h @ w_hh.T + b_hh
            i = jax.nn.sigmoid(g[:, :H])
            f = jax.nn.sigmoid(g[:, H:2 * H])
            gg = jnp.tanh(g[:, 2 * H:3 * H])
            o = jax.nn.sigmoid(g[:, 3 * H:])
            c = f * c + i * gg
            h = o * jnp.tanh(c)
            outs.append(h)
        layer_in = jnp.stack(outs, axis=1)
        h_n.append(h)
        c_n.append(c)
    w_fc, b_fc = params["fc"]
    out = layer_in @ w_fc.T + b_fc
    return out, (jnp.stack(h_n), jnp.stack(c_n))


if __name__ == "__main__":
    # Small shapes consistent with the module's forward.
    batch, seq, input_size = 2, 8, 16
    hidden_dim, n_layers, output_size = 32, 2, 8

    key = jax.random.PRNGKey(0)
    key, xkey = jax.random.split(key)
    x = jax.random.normal(xkey, (batch, seq, input_size), jnp.float32)

    params = init_params(key, input_size, hidden_dim, n_layers, output_size)

    out, (h_n, c_n) = lstm_forward(
        x, params, hidden_dim=hidden_dim, n_layers=n_layers, output_size=output_size
    )
    jax.block_until_ready((out, h_n, c_n))

    # sanity check vs pure-JAX reference
    out_r, (h_r, c_r) = lstm_reference(x, params, hidden_dim=hidden_dim, n_layers=n_layers)
    assert out.shape == (batch, seq, output_size)
    assert h_n.shape == (n_layers, batch, hidden_dim)
    assert c_n.shape == (n_layers, batch, hidden_dim)
    assert jnp.allclose(out, out_r, atol=1e-4), "output mismatch"
    assert jnp.allclose(h_n, h_r, atol=1e-4), "h_n mismatch"
    assert jnp.allclose(c_n, c_r, atol=1e-4), "c_n mismatch"

    print("KERNEL_OK")
</pallas_src>

<mosaic_0001>
module attributes {stable_mosaic.version = 11 : i64} {
  func.func @_lstm_kernel(%arg0: i32, %arg1: memref<8x8x16xf32, #tpu.memory_space<vmem>>, %arg2: memref<16x128xf32, #tpu.memory_space<vmem>>, %arg3: memref<32x128xf32, #tpu.memory_space<vmem>>, %arg4: memref<1x128xf32, #tpu.memory_space<vmem>>, %arg5: memref<32x128xf32, #tpu.memory_space<vmem>>, %arg6: memref<32x128xf32, #tpu.memory_space<vmem>>, %arg7: memref<1x128xf32, #tpu.memory_space<vmem>>, %arg8: memref<32x8xf32, #tpu.memory_space<vmem>>, %arg9: memref<1x8xf32, #tpu.memory_space<vmem>>, %arg10: memref<8x8x8xf32, #tpu.memory_space<vmem>>, %arg11: memref<2x8x32xf32, #tpu.memory_space<vmem>>, %arg12: memref<2x8x32xf32, #tpu.memory_space<vmem>>, %arg13: memref<8x8x32xf32, #tpu.memory_space<vmem>>, %arg14: memref<8x8x128xf32, #tpu.memory_space<vmem>>) attributes {dimension_semantics = [#tpu.dimension_semantics<parallel>], iteration_bounds = array<i64: 1>, scalar_prefetch = 0 : i64, scratch_operands = 2 : i64, tpu.core_type = #tpu.core_type<tc>, window_params = [{transform_indices = @transform_0, window_bounds = array<i64: 8, 8, 16>}, {pipeline_mode = #tpu.pipeline_mode<synchronous>, transform_indices = @transform_1, window_bounds = array<i64: 16, 128>}, {pipeline_mode = #tpu.pipeline_mode<synchronous>, transform_indices = @transform_2, window_bounds = array<i64: 32, 128>}, {pipeline_mode = #tpu.pipeline_mode<synchronous>, transform_indices = @transform_3, window_bounds = array<i64: 1, 128>}, {pipeline_mode = #tpu.pipeline_mode<synchronous>, transform_indices = @transform_4, window_bounds = array<i64: 32, 128>}, {pipeline_mode = #tpu.pipeline_mode<synchronous>, transform_indices = @transform_5, window_bounds = array<i64: 32, 128>}, {pipeline_mode = #tpu.pipeline_mode<synchronous>, transform_indices = @transform_6, window_bounds = array<i64: 1, 128>}, {pipeline_mode = #tpu.pipeline_mode<synchronous>, transform_indices = @transform_7, window_bounds = array<i64: 32, 8>}, {pipeline_mode = #tpu.pipeline_mode<synchronous>, transform_indices = @transform_8, window_bounds = array<i64: 1, 8>}, {transform_indices = @transform_9, window_bounds = array<i64: 8, 8, 8>}, {transform_indices = @transform_10, window_bounds = array<i64: 2, 8, 32>}, {transform_indices = @transform_11, window_bounds = array<i64: 2, 8, 32>}]} {
    %c0 = arith.constant 0 : index
    %c0_0 = arith.constant 0 : index
    %0 = vector.load %arg2[%c0, %c0_0] : memref<16x128xf32, #tpu.memory_space<vmem>>, vector<16x128xf32>
    %c0_1 = arith.constant 0 : index
    %c0_2 = arith.constant 0 : index
    %1 = vector.load %arg3[%c0_1, %c0_2] : memref<32x128xf32, #tpu.memory_space<vmem>>, vector<32x128xf32>
    %c0_3 = arith.constant 0 : index
    %c0_4 = arith.constant 0 : index
    %2 = vector.load %arg4[%c0_3, %c0_4] : memref<1x128xf32, #tpu.memory_space<vmem>>, vector<1x128xf32>
    %c0_5 = arith.constant 0 : index
    %c0_6 = arith.constant 0 : index
    %c0_7 = arith.constant 0 : index
    %3 = vector.load %arg1[%c0_5, %c0_6, %c0_7] : memref<8x8x16xf32, #tpu.memory_space<vmem>>, vector<8x8x16xf32>
    %4 = vector.shape_cast %3 : vector<8x8x16xf32> to vector<64x16xf32>
    %cst = arith.constant dense<0.000000e+00> : vector<64x128xf32>
    %5 = tpu.matmul %4, %0, %cst {dimension_numbers = #tpu.dot_dimension_numbers<[1], [0], [0], [1], [0, 0, 1, 1], [], []>} : vector<64x16xf32>, vector<16x128xf32>, vector<64x128xf32> -> vector<64x128xf32>
    %6 = vector.broadcast %2 : vector<1x128xf32> to vector<64x128xf32>
    %7 = arith.addf %5, %6 : vector<64x128xf32>
    %8 = vector.shape_cast %7 : vector<64x128xf32> to vector<8x8x128xf32>
    %c0_8 = arith.constant 0 : index
    %c0_9 = arith.constant 0 : index
    %c0_10 = arith.constant 0 : index
    %9 = vector.load %arg14[%c0_8, %c0_9, %c0_10] : memref<8x8x128xf32, #tpu.memory_space<vmem>>, vector<8x8x128xf32>
    tpu.vector_store %arg14[%c0_8, %c0_9, %c0_10], %8 {strides = array<i32>} : memref<8x8x128xf32, #tpu.memory_space<vmem>>, vector<8x8x128xf32>,
    %cst_11 = arith.constant 0.000000e+00 : f32
    %10 = vector.broadcast %cst_11 : f32 to vector<8x32xf32>
    %cst_12 = arith.constant 0.000000e+00 : f32
    %11 = vector.broadcast %cst_12 : f32 to vector<8x32xf32>
    %c0_i32 = arith.constant 0 : i32
    %12 = arith.index_cast %c0_i32 : i32 to index
    %c0_13 = arith.constant 0 : index
    %c0_14 = arith.constant 0 : index
    %13 = vector.load %arg14[%12, %c0_13, %c0_14] : memref<8x8x128xf32, #tpu.memory_space<vmem>>, vector<1x8x128xf32>
    %14 = vector.shape_cast %13 : vector<1x8x128xf32> to vector<8x128xf32>
    %cst_15 = arith.constant dense<0.000000e+00> : vector<8x128xf32>
    %15 = tpu.matmul %10, %1, %cst_15 {dimension_numbers = #tpu.dot_dimension_numbers<[1], [0], [0], [1], [0, 0, 1, 1], [], []>} : vector<8x32xf32>, vector<32x128xf32>, vector<8x128xf32> -> vector<8x128xf32>
    %16 = arith.addf %14, %15 : vector<8x128xf32>
    %17 = arith.negf %16 : vector<8x128xf32>
    %18 = math.exp %17 : vector<8x128xf32>
    %cst_16 = arith.constant 1.000000e+00 : f32
    %19 = vector.broadcast %cst_16 : f32 to vector<8x128xf32>
    %20 = arith.addf %19, %18 : vector<8x128xf32>
    %21 = arith.divf %19, %20 : vector<8x128xf32>
    %22 = math.tanh %16 : vector<8x128xf32>
    %23 = vector.extract_strided_slice %21 {offsets = [0, 0], sizes = [8, 32], strides = [1, 1]} : vector<8x128xf32> to vector<8x32xf32>
    %24 = vector.extract_strided_slice %21 {offsets = [0, 32], sizes = [8, 32], strides = [1, 1]} : vector<8x128xf32> to vector<8x32xf32>
    %25 = vector.extract_strided_slice %22 {offsets = [0, 64], sizes = [8, 32], strides = [1, 1]} : vector<8x128xf32> to vector<8x32xf32>
    %26 = vector.extract_strided_slice %21 {offsets = [0, 96], sizes = [8, 32], strides = [1, 1]} : vector<8x128xf32> to vector<8x32xf32>
    %27 = arith.mulf %24, %11 : vector<8x32xf32>
    %28 = arith.mulf %23, %25 : vector<8x32xf32>
    %29 = arith.addf %27, %28 : vector<8x32xf32>
    %30 = math.tanh %29 : vector<8x32xf32>
    %31 = arith.mulf %26, %30 : vector<8x32xf32>
    %32 = arith.index_cast %c0_i32 : i32 to index
    %c0_17 = arith.constant 0 : index
    %c0_18 = arith.constant 0 : index
    %33 = vector.load %arg13[%32, %c0_17, %c0_18] : memref<8x8x32xf32, #tpu.memory_space<vmem>>, vector<1x8x32xf32>
    %34 = vector.shape_cast %33 : vector<1x8x32xf32> to vector<8x32xf32>
    %35 = vector.shape_cast %31 : vector<8x32xf32> to vector<1x8x32xf32>
    tpu.vector_store %arg13[%32, %c0_17, %c0_18], %35 {strides = array<i32>} : memref<8x8x32xf32, #tpu.memory_space<vmem>>, vector<1x8x32xf32>,
    %c1_i32 = arith.constant 1 : i32
    %36 = arith.index_cast %c1_i32 : i32 to index
    %c0_19 = arith.constant 0 : index
    %c0_20 = arith.constant 0 : index
    %37 = vector.load %arg14[%36, %c0_19, %c0_20] : memref<8x8x128xf32, #tpu.memory_space<vmem>>, vector<1x8x128xf32>
    %38 = vector.shape_cast %37 : vector<1x8x128xf32> to vector<8x128xf32>
    %cst_21 = arith.constant dense<0.000000e+00> : vector<8x128xf32>
    %39 = tpu.matmul %31, %1, %cst_21 {dimension_numbers = #tpu.dot_dimension_numbers<[1], [0], [0], [1], [0, 0, 1, 1], [], []>} : vector<8x32xf32>, vector<32x128xf32>, vector<8x128xf32> -> vector<8x128xf32>
    %40 = arith.addf %38, %39 : vector<8x128xf32>
    %41 = arith.negf %40 : vector<8x128xf32>
    %42 = math.exp %41 : vector<8x128xf32>
    %cst_22 = arith.constant 1.000000e+00 : f32
    %43 = vector.broadcast %cst_22 : f32 to vector<8x128xf32>
    %44 = arith.addf %43, %42 : vector<8x128xf32>
    %45 = arith.divf %43, %44 : vector<8x128xf32>
    %46 = math.tanh %40 : vector<8x128xf32>
    %47 = vector.extract_strided_slice %45 {offsets = [0, 0], sizes = [8, 32], strides = [1, 1]} : vector<8x128xf32> to vector<8x32xf32>
    %48 = vector.extract_strided_slice %45 {offsets = [0, 32], sizes = [8, 32], strides = [1, 1]} : vector<8x128xf32> to vector<8x32xf32>
    %49 = vector.extract_strided_slice %46 {offsets = [0, 64], sizes = [8, 32], strides = [1, 1]} : vector<8x128xf32> to vector<8x32xf32>
    %50 = vector.extract_strided_slice %45 {offsets = [0, 96], sizes = [8, 32], strides = [1, 1]} : vector<8x128xf32> to vector<8x32xf32>
    %51 = arith.mulf %48, %29 : vector<8x32xf32>
    %52 = arith.mulf %47, %49 : vector<8x32xf32>
    %53 = arith.addf %51, %52 : vector<8x32xf32>
    %54 = math.tanh %53 : vector<8x32xf32>
    %55 = arith.mulf %50, %54 : vector<8x32xf32>
    %56 = arith.index_cast %c1_i32 : i32 to index
    %c0_23 = arith.constant 0 : index
    %c0_24 = arith.constant 0 : index
    %57 = vector.load %arg13[%56, %c0_23, %c0_24] : memref<8x8x32xf32, #tpu.memory_space<vmem>>, vector<1x8x32xf32>
    %58 = vector.shape_cast %57 : vector<1x8x32xf32> to vector<8x32xf32>
    %59 = vector.shape_cast %55 : vector<8x32xf32> to vector<1x8x32xf32>
    tpu.vector_store %arg13[%56, %c0_23, %c0_24], %59 {strides = array<i32>} : memref<8x8x32xf32, #tpu.memory_space<vmem>>, vector<1x8x32xf32>,
    %c2_i32 = arith.constant 2 : i32
    %60 = arith.index_cast %c2_i32 : i32 to index
    %c0_25 = arith.constant 0 : index
    %c0_26 = arith.constant 0 : index
    %61 = vector.load %arg14[%60, %c0_25, %c0_26] : memref<8x8x128xf32, #tpu.memory_space<vmem>>, vector<1x8x128xf32>
    %62 = vector.shape_cast %61 : vector<1x8x128xf32> to vector<8x128xf32>
    %cst_27 = arith.constant dense<0.000000e+00> : vector<8x128xf32>
    %63 = tpu.matmul %55, %1, %cst_27 {dimension_numbers = #tpu.dot_dimension_numbers<[1], [0], [0], [1], [0, 0, 1, 1], [], []>} : vector<8x32xf32>, vector<32x128xf32>, vector<8x128xf32> -> vector<8x128xf32>
    %64 = arith.addf %62, %63 : vector<8x128xf32>
    %65 = arith.negf %64 : vector<8x128xf32>
    %66 = math.exp %65 : vector<8x128xf32>
    %cst_28 = arith.constant 1.000000e+00 : f32
    %67 = vector.broadcast %cst_28 : f32 to vector<8x128xf32>
    %68 = arith.addf %67, %66 : vector<8x128xf32>
    %69 = arith.divf %67, %68 : vector<8x128xf32>
    %70 = math.tanh %64 : vector<8x128xf32>
    %71 = vector.extract_strided_slice %69 {offsets = [0, 0], sizes = [8, 32], strides = [1, 1]} : vector<8x128xf32> to vector<8x32xf32>
    %72 = vector.extract_strided_slice %69 {offsets = [0, 32], sizes = [8, 32], strides = [1, 1]} : vector<8x128xf32> to vector<8x32xf32>
    %73 = vector.extract_strided_slice %70 {offsets = [0, 64], sizes = [8, 32], strides = [1, 1]} : vector<8x128xf32> to vector<8x32xf32>
    %74 = vector.extract_strided_slice %69 {offsets = [0, 96], sizes = [8, 32], strides = [1, 1]} : vector<8x128xf32> to vector<8x32xf32>
    %75 = arith.mulf %72, %53 : vector<8x32xf32>
    %76 = arith.mulf %71, %73 : vector<8x32xf32>
    %77 = arith.addf %75, %76 : vector<8x32xf32>
    %78 = math.tanh %77 : vector<8x32xf32>
    %79 = arith.mulf %74, %78 : vector<8x32xf32>
    %80 = arith.index_cast %c2_i32 : i32 to index
    %c0_29 = arith.constant 0 : index
    %c0_30 = arith.constant 0 : index
    %81 = vector.load %arg13[%80, %c0_29, %c0_30] : memref<8x8x32xf32, #tpu.memory_space<vmem>>, vector<1x8x32xf32>
    %82 = vector.shape_cast %81 : vector<1x8x32xf32> to vector<8x32xf32>
    %83 = vector.shape_cast %79 : vector<8x32xf32> to vector<1x8x32xf32>
    tpu.vector_store %arg13[%80, %c0_29, %c0_30], %83 {strides = array<i32>} : memref<8x8x32xf32, #tpu.memory_space<vmem>>, vector<1x8x32xf32>,
    %c3_i32 = arith.constant 3 : i32
    %84 = arith.index_cast %c3_i32 : i32 to index
    %c0_31 = arith.constant 0 : index
    %c0_32 = arith.constant 0 : index
    %85 = vector.load %arg14[%84, %c0_31, %c0_32] : memref<8x8x128xf32, #tpu.memory_space<vmem>>, vector<1x8x128xf32>
    %86 = vector.shape_cast %85 : vector<1x8x128xf32> to vector<8x128xf32>
    %cst_33 = arith.constant dense<0.000000e+00> : vector<8x128xf32>
    %87 = tpu.matmul %79, %1, %cst_33 {dimension_numbers = #tpu.dot_dimension_numbers<[1], [0], [0], [1], [0, 0, 1, 1], [], []>} : vector<8x32xf32>, vector<32x128xf32>, vector<8x128xf32> -> vector<8x128xf32>
    %88 = arith.addf %86, %87 : vector<8x128xf32>
    %89 = arith.negf %88 : vector<8x128xf32>
    %90 = math.exp %89 : vector<8x128xf32>
    %cst_34 = arith.constant 1.000000e+00 : f32
    %91 = vector.broadcast %cst_34 : f32 to vector<8x128xf32>
    %92 = arith.addf %91, %90 : vector<8x128xf32>
    %93 = arith.divf %91, %92 : vector<8x128xf32>
    %94 = math.tanh %88 : vector<8x128xf32>
    %95 = vector.extract_strided_slice %93 {offsets = [0, 0], sizes = [8, 32], strides = [1, 1]} : vector<8x128xf32> to vector<8x32xf32>
    %96 = vector.extract_strided_slice %93 {offsets = [0, 32], sizes = [8, 32], strides = [1, 1]} : vector<8x128xf32> to vector<8x32xf32>
    %97 = vector.extract_strided_slice %94 {offsets = [0, 64], sizes = [8, 32], strides = [1, 1]} : vector<8x128xf32> to vector<8x32xf32>
    %98 = vector.extract_strided_slice %93 {offsets = [0, 96], sizes = [8, 32], strides = [1, 1]} : vector<8x128xf32> to vector<8x32xf32>
    %99 = arith.mulf %96, %77 : vector<8x32xf32>
    %100 = arith.mulf %95, %97 : vector<8x32xf32>
    %101 = arith.addf %99, %100 : vector<8x32xf32>
    %102 = math.tanh %101 : vector<8x32xf32>
    %103 = arith.mulf %98, %102 : vector<8x32xf32>
    %104 = arith.index_cast %c3_i32 : i32 to index
    %c0_35 = arith.constant 0 : index
    %c0_36 = arith.constant 0 : index
    %105 = vector.load %arg13[%104, %c0_35, %c0_36] : memref<8x8x32xf32, #tpu.memory_space<vmem>>, vector<1x8x32xf32>
    %106 = vector.shape_cast %105 : vector<1x8x32xf32> to vector<8x32xf32>
    %107 = vector.shape_cast %103 : vector<8x32xf32> to vector<1x8x32xf32>
    tpu.vector_store %arg13[%104, %c0_35, %c0_36], %107 {strides = array<i32>} : memref<8x8x32xf32, #tpu.memory_space<vmem>>, vector<1x8x32xf32>,
    %c4_i32 = arith.constant 4 : i32
    %108 = arith.index_cast %c4_i32 : i32 to index
    %c0_37 = arith.constant 0 : index
    %c0_38 = arith.constant 0 : index
    %109 = vector.load %arg14[%108, %c0_37, %c0_38] : memref<8x8x128xf32, #tpu.memory_space<vmem>>, vector<1x8x128xf32>
    %110 = vector.shape_cast %109 : vector<1x8x128xf32> to vector<8x128xf32>
    %cst_39 = arith.constant dense<0.000000e+00> : vector<8x128xf32>
    %111 = tpu.matmul %103, %1, %cst_39 {dimension_numbers = #tpu.dot_dimension_numbers<[1], [0], [0], [1], [0, 0, 1, 1], [], []>} : vector<8x32xf32>, vector<32x128xf32>, vector<8x128xf32> -> vector<8x128xf32>
    %112 = arith.addf %110, %111 : vector<8x128xf32>
    %113 = arith.negf %112 : vector<8x128xf32>
    %114 = math.exp %113 : vector<8x128xf32>
    %cst_40 = arith.constant 1.000000e+00 : f32
    %115 = vector.broadcast %cst_40 : f32 to vector<8x128xf32>
    %116 = arith.addf %115, %114 : vector<8x128xf32>
    %117 = arith.divf %115, %116 : vector<8x128xf32>
    %118 = math.tanh %112 : vector<8x128xf32>
    %119 = vector.extract_strided_slice %117 {offsets = [0, 0], sizes = [8, 32], strides = [1, 1]} : vector<8x128xf32> to vector<8x32xf32>
    %120 = vector.extract_strided_slice %117 {offsets = [0, 32], sizes = [8, 32], strides = [1, 1]} : vector<8x128xf32> to vector<8x32xf32>
    %121 = vector.extract_strided_slice %118 {offsets = [0, 64], sizes = [8, 32], strides = [1, 1]} : vector<8x128xf32> to vector<8x32xf32>
    %122 = vector.extract_strided_slice %117 {offsets = [0, 96], sizes = [8, 32], strides = [1, 1]} : vector<8x128xf32> to vector<8x32xf32>
    %123 = arith.mulf %120, %101 : vector<8x32xf32>
    %124 = arith.mulf %119, %121 : vector<8x32xf32>
    %125 = arith.addf %123, %124 : vector<8x32xf32>
    %126 = math.tanh %125 : vector<8x32xf32>
    %127 = arith.mulf %122, %126 : vector<8x32xf32>
    %128 = arith.index_cast %c4_i32 : i32 to index
    %c0_41 = arith.constant 0 : index
    %c0_42 = arith.constant 0 : index
    %129 = vector.load %arg13[%128, %c0_41, %c0_42] : memref<8x8x32xf32, #tpu.memory_space<vmem>>, vector<1x8x32xf32>
    %130 = vector.shape_cast %129 : vector<1x8x32xf32> to vector<8x32xf32>
    %131 = vector.shape_cast %127 : vector<8x32xf32> to vector<1x8x32xf32>
    tpu.vector_store %arg13[%128, %c0_41, %c0_42], %131 {strides = array<i32>} : memref<8x8x32xf32, #tpu.memory_space<vmem>>, vector<1x8x32xf32>,
    %c5_i32 = arith.constant 5 : i32
    %132 = arith.index_cast %c5_i32 : i32 to index
    %c0_43 = arith.constant 0 : index
    %c0_44 = arith.constant 0 : index
    %133 = vector.load %arg14[%132, %c0_43, %c0_44] : memref<8x8x128xf32, #tpu.memory_space<vmem>>, vector<1x8x128xf32>
    %134 = vector.shape_cast %133 : vector<1x8x128xf32> to vector<8x128xf32>
    %cst_45 = arith.constant dense<0.000000e+00> : vector<8x128xf32>
    %135 = tpu.matmul %127, %1, %cst_45 {dimension_numbers = #tpu.dot_dimension_numbers<[1], [0], [0], [1], [0, 0, 1, 1], [], []>} : vector<8x32xf32>, vector<32x128xf32>, vector<8x128xf32> -> vector<8x128xf32>
    %136 = arith.addf %134, %135 : vector<8x128xf32>
    %137 = arith.negf %136 : vector<8x128xf32>
    %138 = math.exp %137 : vector<8x128xf32>
    %cst_46 = arith.constant 1.000000e+00 : f32
    %139 = vector.broadcast %cst_46 : f32 to vector<8x128xf32>
    %140 = arith.addf %139, %138 : vector<8x128xf32>
    %141 = arith.divf %139, %140 : vector<8x128xf32>
    %142 = math.tanh %136 : vector<8x128xf32>
    %143 = vector.extract_strided_slice %141 {offsets = [0, 0], sizes = [8, 32], strides = [1, 1]} : vector<8x128xf32> to vector<8x32xf32>
    %144 = vector.extract_strided_slice %141 {offsets = [0, 32], sizes = [8, 32], strides = [1, 1]} : vector<8x128xf32> to vector<8x32xf32>
    %145 = vector.extract_strided_slice %142 {offsets = [0, 64], sizes = [8, 32], strides = [1, 1]} : vector<8x128xf32> to vector<8x32xf32>
    %146 = vector.extract_strided_slice %141 {offsets = [0, 96], sizes = [8, 32], strides = [1, 1]} : vector<8x128xf32> to vector<8x32xf32>
    %147 = arith.mulf %144, %125 : vector<8x32xf32>
    %148 = arith.mulf %143, %145 : vector<8x32xf32>
    %149 = arith.addf %147, %148 : vector<8x32xf32>
    %150 = math.tanh %149 : vector<8x32xf32>
    %151 = arith.mulf %146, %150 : vector<8x32xf32>
    %152 = arith.index_cast %c5_i32 : i32 to index
    %c0_47 = arith.constant 0 : index
    %c0_48 = arith.constant 0 : index
    %153 = vector.load %arg13[%152, %c0_47, %c0_48] : memref<8x8x32xf32, #tpu.memory_space<vmem>>, vector<1x8x32xf32>
    %154 = vector.shape_cast %153 : vector<1x8x32xf32> to vector<8x32xf32>
    %155 = vector.shape_cast %151 : vector<8x32xf32> to vector<1x8x32xf32>
    tpu.vector_store %arg13[%152, %c0_47, %c0_48], %155 {strides = array<i32>} : memref<8x8x32xf32, #tpu.memory_space<vmem>>, vector<1x8x32xf32>,
    %c6_i32 = arith.constant 6 : i32
    %156 = arith.index_cast %c6_i32 : i32 to index
    %c0_49 = arith.constant 0 : index
    %c0_50 = arith.constant 0 : index
    %157 = vector.load %arg14[%156, %c0_49, %c0_50] : memref<8x8x128xf32, #tpu.memory_space<vmem>>, vector<1x8x128xf32>
    %158 = vector.shape_cast %157 : vector<1x8x128xf32> to vector<8x128xf32>
    %cst_51 = arith.constant dense<0.000000e+00> : vector<8x128xf32>
    %159 = tpu.matmul %151, %1, %cst_51 {dimension_numbers = #tpu.dot_dimension_numbers<[1], [0], [0], [1], [0, 0, 1, 1], [], []>} : vector<8x32xf32>, vector<32x128xf32>, vector<8x128xf32> -> vector<8x128xf32>
    %160 = arith.addf %158, %159 : vector<8x128xf32>
    %161 = arith.negf %160 : vector<8x128xf32>
    %162 = math.exp %161 : vector<8x128xf32>
    %cst_52 = arith.constant 1.000000e+00 : f32
    %163 = vector.broadcast %cst_52 : f32 to vector<8x128xf32>
    %164 = arith.addf %163, %162 : vector<8x128xf32>
    %165 = arith.divf %163, %164 : vector<8x128xf32>
    %166 = math.tanh %160 : vector<8x128xf32>
    %167 = vector.extract_strided_slice %165 {offsets = [0, 0], sizes = [8, 32], strides = [1, 1]} : vector<8x128xf32> to vector<8x32xf32>
    %168 = vector.extract_strided_slice %165 {offsets = [0, 32], sizes = [8, 32], strides = [1, 1]} : vector<8x128xf32> to vector<8x32xf32>
    %169 = vector.extract_strided_slice %166 {offsets = [0, 64], sizes = [8, 32], strides = [1, 1]} : vector<8x128xf32> to vector<8x32xf32>
    %170 = vector.extract_strided_slice %165 {offsets = [0, 96], sizes = [8, 32], strides = [1, 1]} : vector<8x128xf32> to vector<8x32xf32>
    %171 = arith.mulf %168, %149 : vector<8x32xf32>
    %172 = arith.mulf %167, %169 : vector<8x32xf32>
    %173 = arith.addf %171, %172 : vector<8x32xf32>
    %174 = math.tanh %173 : vector<8x32xf32>
    %175 = arith.mulf %170, %174 : vector<8x32xf32>
    %176 = arith.index_cast %c6_i32 : i32 to index
    %c0_53 = arith.constant 0 : index
    %c0_54 = arith.constant 0 : index
    %177 = vector.load %arg13[%176, %c0_53, %c0_54] : memref<8x8x32xf32, #tpu.memory_space<vmem>>, vector<1x8x32xf32>
    %178 = vector.shape_cast %177 : vector<1x8x32xf32> to vector<8x32xf32>
    %179 = vector.shape_cast %175 : vector<8x32xf32> to vector<1x8x32xf32>
    tpu.vector_store %arg13[%176, %c0_53, %c0_54], %179 {strides = array<i32>} : memref<8x8x32xf32, #tpu.memory_space<vmem>>, vector<1x8x32xf32>,
    %c7_i32 = arith.constant 7 : i32
    %180 = arith.index_cast %c7_i32 : i32 to index
    %c0_55 = arith.constant 0 : index
    %c0_56 = arith.constant 0 : index
    %181 = vector.load %arg14[%180, %c0_55, %c0_56] : memref<8x8x128xf32, #tpu.memory_space<vmem>>, vector<1x8x128xf32>
    %182 = vector.shape_cast %181 : vector<1x8x128xf32> to vector<8x128xf32>
    %cst_57 = arith.constant dense<0.000000e+00> : vector<8x128xf32>
    %183 = tpu.matmul %175, %1, %cst_57 {dimension_numbers = #tpu.dot_dimension_numbers<[1], [0], [0], [1], [0, 0, 1, 1], [], []>} : vector<8x32xf32>, vector<32x128xf32>, vector<8x128xf32> -> vector<8x128xf32>
    %184 = arith.addf %182, %183 : vector<8x128xf32>
    %185 = arith.negf %184 : vector<8x128xf32>
    %186 = math.exp %185 : vector<8x128xf32>
    %cst_58 = arith.constant 1.000000e+00 : f32
    %187 = vector.broadcast %cst_58 : f32 to vector<8x128xf32>
    %188 = arith.addf %187, %186 : vector<8x128xf32>
    %189 = arith.divf %187, %188 : vector<8x128xf32>
    %190 = math.tanh %184 : vector<8x128xf32>
    %191 = vector.extract_strided_slice %189 {offsets = [0, 0], sizes = [8, 32], strides = [1, 1]} : vector<8x128xf32> to vector<8x32xf32>
    %192 = vector.extract_strided_slice %189 {offsets = [0, 32], sizes = [8, 32], strides = [1, 1]} : vector<8x128xf32> to vector<8x32xf32>
    %193 = vector.extract_strided_slice %190 {offsets = [0, 64], sizes = [8, 32], strides = [1, 1]} : vector<8x128xf32> to vector<8x32xf32>
    %194 = vector.extract_strided_slice %189 {offsets = [0, 96], sizes = [8, 32], strides = [1, 1]} : vector<8x128xf32> to vector<8x32xf32>
    %195 = arith.mulf %192, %173 : vector<8x32xf32>
    %196 = arith.mulf %191, %193 : vector<8x32xf32>
    %197 = arith.addf %195, %196 : vector<8x32xf32>
    %198 = math.tanh %197 : vector<8x32xf32>
    %199 = arith.mulf %194, %198 : vector<8x32xf32>
    %200 = arith.index_cast %c7_i32 : i32 to index
    %c0_59 = arith.constant 0 : index
    %c0_60 = arith.constant 0 : index
    %201 = vector.load %arg13[%200, %c0_59, %c0_60] : memref<8x8x32xf32, #tpu.memory_space<vmem>>, vector<1x8x32xf32>
    %202 = vector.shape_cast %201 : vector<1x8x32xf32> to vector<8x32xf32>
    %203 = vector.shape_cast %199 : vector<8x32xf32> to vector<1x8x32xf32>
    tpu.vector_store %arg13[%200, %c0_59, %c0_60], %203 {strides = array<i32>} : memref<8x8x32xf32, #tpu.memory_space<vmem>>, vector<1x8x32xf32>,
    %c8_i32 = arith.constant 8 : i32
    %c0_61 = arith.constant 0 : index
    %c0_62 = arith.constant 0 : index
    %c0_63 = arith.constant 0 : index
    %204 = vector.load %arg11[%c0_61, %c0_62, %c0_63] : memref<2x8x32xf32, #tpu.memory_space<vmem>>, vector<1x8x32xf32>
    %205 = vector.shape_cast %204 : vector<1x8x32xf32> to vector<8x32xf32>
    %206 = vector.shape_cast %199 : vector<8x32xf32> to vector<1x8x32xf32>
    tpu.vector_store %arg11[%c0_61, %c0_62, %c0_63], %206 {strides = array<i32>} : memref<2x8x32xf32, #tpu.memory_space<vmem>>, vector<1x8x32xf32>,
    %c0_64 = arith.constant 0 : index
    %c0_65 = arith.constant 0 : index
    %c0_66 = arith.constant 0 : index
    %207 = vector.load %arg12[%c0_64, %c0_65, %c0_66] : memref<2x8x32xf32, #tpu.memory_space<vmem>>, vector<1x8x32xf32>
    %208 = vector.shape_cast %207 : vector<1x8x32xf32> to vector<8x32xf32>
    %209 = vector.shape_cast %197 : vector<8x32xf32> to vector<1x8x32xf32>
    tpu.vector_store %arg12[%c0_64, %c0_65, %c0_66], %209 {strides = array<i32>} : memref<2x8x32xf32, #tpu.memory_space<vmem>>, vector<1x8x32xf32>,
    %c0_67 = arith.constant 0 : index
    %c0_68 = arith.constant 0 : index
    %210 = vector.load %arg5[%c0_67, %c0_68] : memref<32x128xf32, #tpu.memory_space<vmem>>, vector<32x128xf32>
    %c0_69 = arith.constant 0 : index
    %c0_70 = arith.constant 0 : index
    %211 = vector.load %arg6[%c0_69, %c0_70] : memref<32x128xf32, #tpu.memory_space<vmem>>, vector<32x128xf32>
    %c0_71 = arith.constant 0 : index
    %c0_72 = arith.constant 0 : index
    %212 = vector.load %arg7[%c0_71, %c0_72] : memref<1x128xf32, #tpu.memory_space<vmem>>, vector<1x128xf32>
    %c0_73 = arith.constant 0 : index
    %c0_74 = arith.constant 0 : index
    %c0_75 = arith.constant 0 : index
    %213 = vector.load %arg13[%c0_73, %c0_74, %c0_75] : memref<8x8x32xf32, #tpu.memory_space<vmem>>, vector<8x8x32xf32>
    %214 = vector.shape_cast %213 : vector<8x8x32xf32> to vector<64x32xf32>
    %cst_76 = arith.constant dense<0.000000e+00> : vector<64x128xf32>
    %215 = tpu.matmul %214, %210, %cst_76 {dimension_numbers = #tpu.dot_dimension_numbers<[1], [0], [0], [1], [0, 0, 1, 1], [], []>} : vector<64x32xf32>, vector<32x128xf32>, vector<64x128xf32> -> vector<64x128xf32>
    %216 = vector.broadcast %212 : vector<1x128xf32> to vector<64x128xf32>
    %217 = arith.addf %215, %216 : vector<64x128xf32>
    %218 = vector.shape_cast %217 : vector<64x128xf32> to vector<8x8x128xf32>
    %c0_77 = arith.constant 0 : index
    %c0_78 = arith.constant 0 : index
    %c0_79 = arith.constant 0 : index
    %219 = vector.load %arg14[%c0_77, %c0_78, %c0_79] : memref<8x8x128xf32, #tpu.memory_space<vmem>>, vector<8x8x128xf32>
    tpu.vector_store %arg14[%c0_77, %c0_78, %c0_79], %218 {strides = array<i32>} : memref<8x8x128xf32, #tpu.memory_space<vmem>>, vector<8x8x128xf32>,
    %cst_80 = arith.constant 0.000000e+00 : f32
    %220 = vector.broadcast %cst_80 : f32 to vector<8x32xf32>
    %cst_81 = arith.constant 0.000000e+00 : f32
    %221 = vector.broadcast %cst_81 : f32 to vector<8x32xf32>
    %c0_i32_82 = arith.constant 0 : i32
    %222 = arith.index_cast %c0_i32_82 : i32 to index
    %c0_83 = arith.constant 0 : index
    %c0_84 = arith.constant 0 : index
    %223 = vector.load %arg14[%222, %c0_83, %c0_84] : memref<8x8x128xf32, #tpu.memory_space<vmem>>, vector<1x8x128xf32>
    %224 = vector.shape_cast %223 : vector<1x8x128xf32> to vector<8x128xf32>
    %cst_85 = arith.constant dense<0.000000e+00> : vector<8x128xf32>
    %225 = tpu.matmul %220, %211, %cst_85 {dimension_numbers = #tpu.dot_dimension_numbers<[1], [0], [0], [1], [0, 0, 1, 1], [], []>} : vector<8x32xf32>, vector<32x128xf32>, vector<8x128xf32> -> vector<8x128xf32>
    %226 = arith.addf %224, %225 : vector<8x128xf32>
    %227 = arith.negf %226 : vector<8x128xf32>
    %228 = math.exp %227 : vector<8x128xf32>
    %cst_86 = arith.constant 1.000000e+00 : f32
    %229 = vector.broadcast %cst_86 : f32 to vector<8x128xf32>
    %230 = arith.addf %229, %228 : vector<8x128xf32>
    %231 = arith.divf %229, %230 : vector<8x128xf32>
    %232 = math.tanh %226 : vector<8x128xf32>
    %233 = vector.extract_strided_slice %231 {offsets = [0, 0], sizes = [8, 32], strides = [1, 1]} : vector<8x128xf32> to vector<8x32xf32>
    %234 = vector.extract_strided_slice %231 {offsets = [0, 32], sizes = [8, 32], strides = [1, 1]} : vector<8x128xf32> to vector<8x32xf32>
    %235 = vector.extract_strided_slice %232 {offsets = [0, 64], sizes = [8, 32], strides = [1, 1]} : vector<8x128xf32> to vector<8x32xf32>
    %236 = vector.extract_strided_slice %231 {offsets = [0, 96], sizes = [8, 32], strides = [1, 1]} : vector<8x128xf32> to vector<8x32xf32>
    %237 = arith.mulf %234, %221 : vector<8x32xf32>
    %238 = arith.mulf %233, %235 : vector<8x32xf32>
    %239 = arith.addf %237, %238 : vector<8x32xf32>
    %240 = math.tanh %239 : vector<8x32xf32>
    %241 = arith.mulf %236, %240 : vector<8x32xf32>
    %242 = arith.index_cast %c0_i32_82 : i32 to index
    %c0_87 = arith.constant 0 : index
    %c0_88 = arith.constant 0 : index
    %243 = vector.load %arg13[%242, %c0_87, %c0_88] : memref<8x8x32xf32, #tpu.memory_space<vmem>>, vector<1x8x32xf32>
    %244 = vector.shape_cast %243 : vector<1x8x32xf32> to vector<8x32xf32>
    %245 = vector.shape_cast %241 : vector<8x32xf32> to vector<1x8x32xf32>
    tpu.vector_store %arg13[%242, %c0_87, %c0_88], %245 {strides = array<i32>} : memref<8x8x32xf32, #tpu.memory_space<vmem>>, vector<1x8x32xf32>,
    %c1_i32_89 = arith.constant 1 : i32
    %246 = arith.index_cast %c1_i32_89 : i32 to index
    %c0_90 = arith.constant 0 : index
    %c0_91 = arith.constant 0 : index
    %247 = vector.load %arg14[%246, %c0_90, %c0_91] : memref<8x8x128xf32, #tpu.memory_space<vmem>>, vector<1x8x128xf32>
    %248 = vector.shape_cast %247 : vector<1x8x128xf32> to vector<8x128xf32>
    %cst_92 = arith.constant dense<0.000000e+00> : vector<8x128xf32>
    %249 = tpu.matmul %241, %211, %cst_92 {dimension_numbers = #tpu.dot_dimension_numbers<[1], [0], [0], [1], [0, 0, 1, 1], [], []>} : vector<8x32xf32>, vector<32x128xf32>, vector<8x128xf32> -> vector<8x128xf32>
    %250 = arith.addf %248, %249 : vector<8x128xf32>
    %251 = arith.negf %250 : vector<8x128xf32>
    %252 = math.exp %251 : vector<8x128xf32>
    %cst_93 = arith.constant 1.000000e+00 : f32
    %253 = vector.broadcast %cst_93 : f32 to vector<8x128xf32>
    %254 = arith.addf %253, %252 : vector<8x128xf32>
    %255 = arith.divf %253, %254 : vector<8x128xf32>
    %256 = math.tanh %250 : vector<8x128xf32>
    %257 = vector.extract_strided_slice %255 {offsets = [0, 0], sizes = [8, 32], strides = [1, 1]} : vector<8x128xf32> to vector<8x32xf32>
    %258 = vector.extract_strided_slice %255 {offsets = [0, 32], sizes = [8, 32], strides = [1, 1]} : vector<8x128xf32> to vector<8x32xf32>
    %259 = vector.extract_strided_slice %256 {offsets = [0, 64], sizes = [8, 32], strides = [1, 1]} : vector<8x128xf32> to vector<8x32xf32>
    %260 = vector.extract_strided_slice %255 {offsets = [0, 96], sizes = [8, 32], strides = [1, 1]} : vector<8x128xf32> to vector<8x32xf32>
    %261 = arith.mulf %258, %239 : vector<8x32xf32>
    %262 = arith.mulf %257, %259 : vector<8x32xf32>
    %263 = arith.addf %261, %262 : vector<8x32xf32>
    %264 = math.tanh %263 : vector<8x32xf32>
    %265 = arith.mulf %260, %264 : vector<8x32xf32>
    %266 = arith.index_cast %c1_i32_89 : i32 to index
    %c0_94 = arith.constant 0 : index
    %c0_95 = arith.constant 0 : index
    %267 = vector.load %arg13[%266, %c0_94, %c0_95] : memref<8x8x32xf32, #tpu.memory_space<vmem>>, vector<1x8x32xf32>
    %268 = vector.shape_cast %267 : vector<1x8x32xf32> to vector<8x32xf32>
    %269 = vector.shape_cast %265 : vector<8x32xf32> to vector<1x8x32xf32>
    tpu.vector_store %arg13[%266, %c0_94, %c0_95], %269 {strides = array<i32>} : memref<8x8x32xf32, #tpu.memory_space<vmem>>, vector<1x8x32xf32>,
    %c2_i32_96 = arith.constant 2 : i32
    %270 = arith.index_cast %c2_i32_96 : i32 to index
    %c0_97 = arith.constant 0 : index
    %c0_98 = arith.constant 0 : index
    %271 = vector.load %arg14[%270, %c0_97, %c0_98] : memref<8x8x128xf32, #tpu.memory_space<vmem>>, vector<1x8x128xf32>
    %272 = vector.shape_cast %271 : vector<1x8x128xf32> to vector<8x128xf32>
    %cst_99 = arith.constant dense<0.000000e+00> : vector<8x128xf32>
    %273 = tpu.matmul %265, %211, %cst_99 {dimension_numbers = #tpu.dot_dimension_numbers<[1], [0], [0], [1], [0, 0, 1, 1], [], []>} : vector<8x32xf32>, vector<32x128xf32>, vector<8x128xf32> -> vector<8x128xf32>
    %274 = arith.addf %272, %273 : vector<8x128xf32>
    %275 = arith.negf %274 : vector<8x128xf32>
    %276 = math.exp %275 : vector<8x128xf32>
    %cst_100 = arith.constant 1.000000e+00 : f32
    %277 = vector.broadcast %cst_100 : f32 to vector<8x128xf32>
    %278 = arith.addf %277, %276 : vector<8x128xf32>
    %279 = arith.divf %277, %278 : vector<8x128xf32>
    %280 = math.tanh %274 : vector<8x128xf32>
    %281 = vector.extract_strided_slice %279 {offsets = [0, 0], sizes = [8, 32], strides = [1, 1]} : vector<8x128xf32> to vector<8x32xf32>
    %282 = vector.extract_strided_slice %279 {offsets = [0, 32], sizes = [8, 32], strides = [1, 1]} : vector<8x128xf32> to vector<8x32xf32>
    %283 = vector.extract_strided_slice %280 {offsets = [0, 64], sizes = [8, 32], strides = [1, 1]} : vector<8x128xf32> to vector<8x32xf32>
    %284 = vector.extract_strided_slice %279 {offsets = [0, 96], sizes = [8, 32], strides = [1, 1]} : vector<8x128xf32> to vector<8x32xf32>
    %285 = arith.mulf %282, %263 : vector<8x32xf32>
    %286 = arith.mulf %281, %283 : vector<8x32xf32>
    %287 = arith.addf %285, %286 : vector<8x32xf32>
    %288 = math.tanh %287 : vector<8x32xf32>
    %289 = arith.mulf %284, %288 : vector<8x32xf32>
    %290 = arith.index_cast %c2_i32_96 : i32 to index
    %c0_101 = arith.constant 0 : index
    %c0_102 = arith.constant 0 : index
    %291 = vector.load %arg13[%290, %c0_101, %c0_102] : memref<8x8x32xf32, #tpu.memory_space<vmem>>, vector<1x8x32xf32>
    %292 = vector.shape_cast %291 : vector<1x8x32xf32> to vector<8x32xf32>
    %293 = vector.shape_cast %289 : vector<8x32xf32> to vector<1x8x32xf32>
    tpu.vector_store %arg13[%290, %c0_101, %c0_102], %293 {strides = array<i32>} : memref<8x8x32xf32, #tpu.memory_space<vmem>>, vector<1x8x32xf32>,
    %c3_i32_103 = arith.constant 3 : i32
    %294 = arith.index_cast %c3_i32_103 : i32 to index
    %c0_104 = arith.constant 0 : index
    %c0_105 = arith.constant 0 : index
    %295 = vector.load %arg14[%294, %c0_104, %c0_105] : memref<8x8x128xf32, #tpu.memory_space<vmem>>, vector<1x8x128xf32>
    %296 = vector.shape_cast %295 : vector<1x8x128xf32> to vector<8x128xf32>
    %cst_106 = arith.constant dense<0.000000e+00> : vector<8x128xf32>
    %297 = tpu.matmul %289, %211, %cst_106 {dimension_numbers = #tpu.dot_dimension_numbers<[1], [0], [0], [1], [0, 0, 1, 1], [], []>} : vector<8x32xf32>, vector<32x128xf32>, vector<8x128xf32> -> vector<8x128xf32>
    %298 = arith.addf %296, %297 : vector<8x128xf32>
    %299 = arith.negf %298 : vector<8x128xf32>
    %300 = math.exp %299 : vector<8x128xf32>
    %cst_107 = arith.constant 1.000000e+00 : f32
    %301 = vector.broadcast %cst_107 : f32 to vector<8x128xf32>
    %302 = arith.addf %301, %300 : vector<8x128xf32>
    %303 = arith.divf %301, %302 : vector<8x128xf32>
    %304 = math.tanh %298 : vector<8x128xf32>
    %305 = vector.extract_strided_slice %303 {offsets = [0, 0], sizes = [8, 32], strides = [1, 1]} : vector<8x128xf32> to vector<8x32xf32>
    %306 = vector.extract_strided_slice %303 {offsets = [0, 32], sizes = [8, 32], strides = [1, 1]} : vector<8x128xf32> to vector<8x32xf32>
    %307 = vector.extract_strided_slice %304 {offsets = [0, 64], sizes = [8, 32], strides = [1, 1]} : vector<8x128xf32> to vector<8x32xf32>
    %308 = vector.extract_strided_slice %303 {offsets = [0, 96], sizes = [8, 32], strides = [1, 1]} : vector<8x128xf32> to vector<8x32xf32>
    %309 = arith.mulf %306, %287 : vector<8x32xf32>
    %310 = arith.mulf %305, %307 : vector<8x32xf32>
    %311 = arith.addf %309, %310 : vector<8x32xf32>
    %312 = math.tanh %311 : vector<8x32xf32>
    %313 = arith.mulf %308, %312 : vector<8x32xf32>
    %314 = arith.index_cast %c3_i32_103 : i32 to index
    %c0_108 = arith.constant 0 : index
    %c0_109 = arith.constant 0 : index
    %315 = vector.load %arg13[%314, %c0_108, %c0_109] : memref<8x8x32xf32, #tpu.memory_space<vmem>>, vector<1x8x32xf32>
    %316 = vector.shape_cast %315 : vector<1x8x32xf32> to vector<8x32xf32>
    %317 = vector.shape_cast %313 : vector<8x32xf32> to vector<1x8x32xf32>
    tpu.vector_store %arg13[%314, %c0_108, %c0_109], %317 {strides = array<i32>} : memref<8x8x32xf32, #tpu.memory_space<vmem>>, vector<1x8x32xf32>,
    %c4_i32_110 = arith.constant 4 : i32
    %318 = arith.index_cast %c4_i32_110 : i32 to index
    %c0_111 = arith.constant 0 : index
    %c0_112 = arith.constant 0 : index
    %319 = vector.load %arg14[%318, %c0_111, %c0_112] : memref<8x8x128xf32, #tpu.memory_space<vmem>>, vector<1x8x128xf32>
    %320 = vector.shape_cast %319 : vector<1x8x128xf32> to vector<8x128xf32>
    %cst_113 = arith.constant dense<0.000000e+00> : vector<8x128xf32>
    %321 = tpu.matmul %313, %211, %cst_113 {dimension_numbers = #tpu.dot_dimension_numbers<[1], [0], [0], [1], [0, 0, 1, 1], [], []>} : vector<8x32xf32>, vector<32x128xf32>, vector<8x128xf32> -> vector<8x128xf32>
    %322 = arith.addf %320, %321 : vector<8x128xf32>
    %323 = arith.negf %322 : vector<8x128xf32>
    %324 = math.exp %323 : vector<8x128xf32>
    %cst_114 = arith.constant 1.000000e+00 : f32
    %325 = vector.broadcast %cst_114 : f32 to vector<8x128xf32>
    %326 = arith.addf %325, %324 : vector<8x128xf32>
    %327 = arith.divf %325, %326 : vector<8x128xf32>
    %328 = math.tanh %322 : vector<8x128xf32>
    %329 = vector.extract_strided_slice %327 {offsets = [0, 0], sizes = [8, 32], strides = [1, 1]} : vector<8x128xf32> to vector<8x32xf32>
    %330 = vector.extract_strided_slice %327 {offsets = [0, 32], sizes = [8, 32], strides = [1, 1]} : vector<8x128xf32> to vector<8x32xf32>
    %331 = vector.extract_strided_slice %328 {offsets = [0, 64], sizes = [8, 32], strides = [1, 1]} : vector<8x128xf32> to vector<8x32xf32>
    %332 = vector.extract_strided_slice %327 {offsets = [0, 96], sizes = [8, 32], strides = [1, 1]} : vector<8x128xf32> to vector<8x32xf32>
    %333 = arith.mulf %330, %311 : vector<8x32xf32>
    %334 = arith.mulf %329, %331 : vector<8x32xf32>
    %335 = arith.addf %333, %334 : vector<8x32xf32>
    %336 = math.tanh %335 : vector<8x32xf32>
    %337 = arith.mulf %332, %336 : vector<8x32xf32>
    %338 = arith.index_cast %c4_i32_110 : i32 to index
    %c0_115 = arith.constant 0 : index
    %c0_116 = arith.constant 0 : index
    %339 = vector.load %arg13[%338, %c0_115, %c0_116] : memref<8x8x32xf32, #tpu.memory_space<vmem>>, vector<1x8x32xf32>
    %340 = vector.shape_cast %339 : vector<1x8x32xf32> to vector<8x32xf32>
    %341 = vector.shape_cast %337 : vector<8x32xf32> to vector<1x8x32xf32>
    tpu.vector_store %arg13[%338, %c0_115, %c0_116], %341 {strides = array<i32>} : memref<8x8x32xf32, #tpu.memory_space<vmem>>, vector<1x8x32xf32>,
    %c5_i32_117 = arith.constant 5 : i32
    %342 = arith.index_cast %c5_i32_117 : i32 to index
    %c0_118 = arith.constant 0 : index
    %c0_119 = arith.constant 0 : index
    %343 = vector.load %arg14[%342, %c0_118, %c0_119] : memref<8x8x128xf32, #tpu.memory_space<vmem>>, vector<1x8x128xf32>
    %344 = vector.shape_cast %343 : vector<1x8x128xf32> to vector<8x128xf32>
    %cst_120 = arith.constant dense<0.000000e+00> : vector<8x128xf32>
    %345 = tpu.matmul %337, %211, %cst_120 {dimension_numbers = #tpu.dot_dimension_numbers<[1], [0], [0], [1], [0, 0, 1, 1], [], []>} : vector<8x32xf32>, vector<32x128xf32>, vector<8x128xf32> -> vector<8x128xf32>
    %346 = arith.addf %344, %345 : vector<8x128xf32>
    %347 = arith.negf %346 : vector<8x128xf32>
    %348 = math.exp %347 : vector<8x128xf32>
    %cst_121 = arith.constant 1.000000e+00 : f32
    %349 = vector.broadcast %cst_121 : f32 to vector<8x128xf32>
    %350 = arith.addf %349, %348 : vector<8x128xf32>
    %351 = arith.divf %349, %350 : vector<8x128xf32>
    %352 = math.tanh %346 : vector<8x128xf32>
    %353 = vector.extract_strided_slice %351 {offsets = [0, 0], sizes = [8, 32], strides = [1, 1]} : vector<8x128xf32> to vector<8x32xf32>
    %354 = vector.extract_strided_slice %351 {offsets = [0, 32], sizes = [8, 32], strides = [1, 1]} : vector<8x128xf32> to vector<8x32xf32>
    %355 = vector.extract_strided_slice %352 {offsets = [0, 64], sizes = [8, 32], strides = [1, 1]} : vector<8x128xf32> to vector<8x32xf32>
    %356 = vector.extract_strided_slice %351 {offsets = [0, 96], sizes = [8, 32], strides = [1, 1]} : vector<8x128xf32> to vector<8x32xf32>
    %357 = arith.mulf %354, %335 : vector<8x32xf32>
    %358 = arith.mulf %353, %355 : vector<8x32xf32>
    %359 = arith.addf %357, %358 : vector<8x32xf32>
    %360 = math.tanh %359 : vector<8x32xf32>
    %361 = arith.mulf %356, %360 : vector<8x32xf32>
    %362 = arith.index_cast %c5_i32_117 : i32 to index
    %c0_122 = arith.constant 0 : index
    %c0_123 = arith.constant 0 : index
    %363 = vector.load %arg13[%362, %c0_122, %c0_123] : memref<8x8x32xf32, #tpu.memory_space<vmem>>, vector<1x8x32xf32>
    %364 = vector.shape_cast %363 : vector<1x8x32xf32> to vector<8x32xf32>
    %365 = vector.shape_cast %361 : vector<8x32xf32> to vector<1x8x32xf32>
    tpu.vector_store %arg13[%362, %c0_122, %c0_123], %365 {strides = array<i32>} : memref<8x8x32xf32, #tpu.memory_space<vmem>>, vector<1x8x32xf32>,
    %c6_i32_124 = arith.constant 6 : i32
    %366 = arith.index_cast %c6_i32_124 : i32 to index
    %c0_125 = arith.constant 0 : index
    %c0_126 = arith.constant 0 : index
    %367 = vector.load %arg14[%366, %c0_125, %c0_126] : memref<8x8x128xf32, #tpu.memory_space<vmem>>, vector<1x8x128xf32>
    %368 = vector.shape_cast %367 : vector<1x8x128xf32> to vector<8x128xf32>
    %cst_127 = arith.constant dense<0.000000e+00> : vector<8x128xf32>
    %369 = tpu.matmul %361, %211, %cst_127 {dimension_numbers = #tpu.dot_dimension_numbers<[1], [0], [0], [1], [0, 0, 1, 1], [], []>} : vector<8x32xf32>, vector<32x128xf32>, vector<8x128xf32> -> vector<8x128xf32>
    %370 = arith.addf %368, %369 : vector<8x128xf32>
    %371 = arith.negf %370 : vector<8x128xf32>
    %372 = math.exp %371 : vector<8x128xf32>
    %cst_128 = arith.constant 1.000000e+00 : f32
    %373 = vector.broadcast %cst_128 : f32 to vector<8x128xf32>
    %374 = arith.addf %373, %372 : vector<8x128xf32>
    %375 = arith.divf %373, %374 : vector<8x128xf32>
    %376 = math.tanh %370 : vector<8x128xf32>
    %377 = vector.extract_strided_slice %375 {offsets = [0, 0], sizes = [8, 32], strides = [1, 1]} : vector<8x128xf32> to vector<8x32xf32>
    %378 = vector.extract_strided_slice %375 {offsets = [0, 32], sizes = [8, 32], strides = [1, 1]} : vector<8x128xf32> to vector<8x32xf32>
    %379 = vector.extract_strided_slice %376 {offsets = [0, 64], sizes = [8, 32], strides = [1, 1]} : vector<8x128xf32> to vector<8x32xf32>
    %380 = vector.extract_strided_slice %375 {offsets = [0, 96], sizes = [8, 32], strides = [1, 1]} : vector<8x128xf32> to vector<8x32xf32>
    %381 = arith.mulf %378, %359 : vector<8x32xf32>
    %382 = arith.mulf %377, %379 : vector<8x32xf32>
    %383 = arith.addf %381, %382 : vector<8x32xf32>
    %384 = math.tanh %383 : vector<8x32xf32>
    %385 = arith.mulf %380, %384 : vector<8x32xf32>
    %386 = arith.index_cast %c6_i32_124 : i32 to index
    %c0_129 = arith.constant 0 : index
    %c0_130 = arith.constant 0 : index
    %387 = vector.load %arg13[%386, %c0_129, %c0_130] : memref<8x8x32xf32, #tpu.memory_space<vmem>>, vector<1x8x32xf32>
    %388 = vector.shape_cast %387 : vector<1x8x32xf32> to vector<8x32xf32>
    %389 = vector.shape_cast %385 : vector<8x32xf32> to vector<1x8x32xf32>
    tpu.vector_store %arg13[%386, %c0_129, %c0_130], %389 {strides = array<i32>} : memref<8x8x32xf32, #tpu.memory_space<vmem>>, vector<1x8x32xf32>,
    %c7_i32_131 = arith.constant 7 : i32
    %390 = arith.index_cast %c7_i32_131 : i32 to index
    %c0_132 = arith.constant 0 : index
    %c0_133 = arith.constant 0 : index
    %391 = vector.load %arg14[%390, %c0_132, %c0_133] : memref<8x8x128xf32, #tpu.memory_space<vmem>>, vector<1x8x128xf32>
    %392 = vector.shape_cast %391 : vector<1x8x128xf32> to vector<8x128xf32>
    %cst_134 = arith.constant dense<0.000000e+00> : vector<8x128xf32>
    %393 = tpu.matmul %385, %211, %cst_134 {dimension_numbers = #tpu.dot_dimension_numbers<[1], [0], [0], [1], [0, 0, 1, 1], [], []>} : vector<8x32xf32>, vector<32x128xf32>, vector<8x128xf32> -> vector<8x128xf32>
    %394 = arith.addf %392, %393 : vector<8x128xf32>
    %395 = arith.negf %394 : vector<8x128xf32>
    %396 = math.exp %395 : vector<8x128xf32>
    %cst_135 = arith.constant 1.000000e+00 : f32
    %397 = vector.broadcast %cst_135 : f32 to vector<8x128xf32>
    %398 = arith.addf %397, %396 : vector<8x128xf32>
    %399 = arith.divf %397, %398 : vector<8x128xf32>
    %400 = math.tanh %394 : vector<8x128xf32>
    %401 = vector.extract_strided_slice %399 {offsets = [0, 0], sizes = [8, 32], strides = [1, 1]} : vector<8x128xf32> to vector<8x32xf32>
    %402 = vector.extract_strided_slice %399 {offsets = [0, 32], sizes = [8, 32], strides = [1, 1]} : vector<8x128xf32> to vector<8x32xf32>
    %403 = vector.extract_strided_slice %400 {offsets = [0, 64], sizes = [8, 32], strides = [1, 1]} : vector<8x128xf32> to vector<8x32xf32>
    %404 = vector.extract_strided_slice %399 {offsets = [0, 96], sizes = [8, 32], strides = [1, 1]} : vector<8x128xf32> to vector<8x32xf32>
    %405 = arith.mulf %402, %383 : vector<8x32xf32>
    %406 = arith.mulf %401, %403 : vector<8x32xf32>
    %407 = arith.addf %405, %406 : vector<8x32xf32>
    %408 = math.tanh %407 : vector<8x32xf32>
    %409 = arith.mulf %404, %408 : vector<8x32xf32>
    %410 = arith.index_cast %c7_i32_131 : i32 to index
    %c0_136 = arith.constant 0 : index
    %c0_137 = arith.constant 0 : index
    %411 = vector.load %arg13[%410, %c0_136, %c0_137] : memref<8x8x32xf32, #tpu.memory_space<vmem>>, vector<1x8x32xf32>
    %412 = vector.shape_cast %411 : vector<1x8x32xf32> to vector<8x32xf32>
    %413 = vector.shape_cast %409 : vector<8x32xf32> to vector<1x8x32xf32>
    tpu.vector_store %arg13[%410, %c0_136, %c0_137], %413 {strides = array<i32>} : memref<8x8x32xf32, #tpu.memory_space<vmem>>, vector<1x8x32xf32>,
    %c8_i32_138 = arith.constant 8 : i32
    %c1 = arith.constant 1 : index
    %c0_139 = arith.constant 0 : index
    %c0_140 = arith.constant 0 : index
    %414 = vector.load %arg11[%c1, %c0_139, %c0_140] : memref<2x8x32xf32, #tpu.memory_space<vmem>>, vector<1x8x32xf32>
    %415 = vector.shape_cast %414 : vector<1x8x32xf32> to vector<8x32xf32>
    %416 = vector.shape_cast %409 : vector<8x32xf32> to vector<1x8x32xf32>
    tpu.vector_store %arg11[%c1, %c0_139, %c0_140], %416 {strides = array<i32>} : memref<2x8x32xf32, #tpu.memory_space<vmem>>, vector<1x8x32xf32>,
    %c1_141 = arith.constant 1 : index
    %c0_142 = arith.constant 0 : index
    %c0_143 = arith.constant 0 : index
    %417 = vector.load %arg12[%c1_141, %c0_142, %c0_143] : memref<2x8x32xf32, #tpu.memory_space<vmem>>, vector<1x8x32xf32>
    %418 = vector.shape_cast %417 : vector<1x8x32xf32> to vector<8x32xf32>
    %419 = vector.shape_cast %407 : vector<8x32xf32> to vector<1x8x32xf32>
    tpu.vector_store %arg12[%c1_141, %c0_142, %c0_143], %419 {strides = array<i32>} : memref<2x8x32xf32, #tpu.memory_space<vmem>>, vector<1x8x32xf32>,
    %c0_144 = arith.constant 0 : index
    %c0_145 = arith.constant 0 : index
    %c0_146 = arith.constant 0 : index
    %420 = vector.load %arg13[%c0_144, %c0_145, %c0_146] : memref<8x8x32xf32, #tpu.memory_space<vmem>>, vector<8x8x32xf32>
    %421 = vector.shape_cast %420 : vector<8x8x32xf32> to vector<64x32xf32>
    %c0_147 = arith.constant 0 : index
    %c0_148 = arith.constant 0 : index
    %422 = vector.load %arg8[%c0_147, %c0_148] : memref<32x8xf32, #tpu.memory_space<vmem>>, vector<32x8xf32>
    %cst_149 = arith.constant dense<0.000000e+00> : vector<64x8xf32>
    %423 = tpu.matmul %421, %422, %cst_149 {dimension_numbers = #tpu.dot_dimension_numbers<[1], [0], [0], [1], [0, 0, 1, 1], [], []>} : vector<64x32xf32>, vector<32x8xf32>, vector<64x8xf32> -> vector<64x8xf32>
    %c0_150 = arith.constant 0 : index
    %c0_151 = arith.constant 0 : index
    %424 = vector.load %arg9[%c0_150, %c0_151] : memref<1x8xf32, #tpu.memory_space<vmem>>, vector<1x8xf32>
    %425 = vector.broadcast %424 : vector<1x8xf32> to vector<64x8xf32>
    %426 = arith.addf %423, %425 : vector<64x8xf32>
    %427 = vector.shape_cast %426 : vector<64x8xf32> to vector<8x8x8xf32>
    %c0_152 = arith.constant 0 : index
    %c0_153 = arith.constant 0 : index
    %c0_154 = arith.constant 0 : index
    %428 = vector.load %arg10[%c0_152, %c0_153, %c0_154] : memref<8x8x8xf32, #tpu.memory_space<vmem>>, vector<8x8x8xf32>
    tpu.vector_store %arg10[%c0_152, %c0_153, %c0_154], %427 {strides = array<i32>} : memref<8x8x8xf32, #tpu.memory_space<vmem>>, vector<8x8x8xf32>,
    return
  }
  func.func @transform_0(%arg0: i32) -> (i32, i32, i32) {
    %c0_i32 = arith.constant 0 : i32
    %c0_i32_0 = arith.constant 0 : i32
    %c0_i32_1 = arith.constant 0 : i32
    return %c0_i32, %arg0, %c0_i32_0 : i32, i32, i32
  }
  func.func @transform_1(%arg0: i32) -> (i32, i32) {
    %c0_i32 = arith.constant 0 : i32
    %c0_i32_0 = arith.constant 0 : i32
    %c0_i32_1 = arith.constant 0 : i32
    return %c0_i32, %c0_i32_0 : i32, i32
  }
  func.func @transform_2(%arg0: i32) -> (i32, i32) {
    %c0_i32 = arith.constant 0 : i32
    %c0_i32_0 = arith.constant 0 : i32
    %c0_i32_1 = arith.constant 0 : i32
    return %c0_i32, %c0_i32_0 : i32, i32
  }
  func.func @transform_3(%arg0: i32) -> (i32, i32) {
    %c0_i32 = arith.constant 0 : i32
    %c0_i32_0 = arith.constant 0 : i32
    %c0_i32_1 = arith.constant 0 : i32
    return %c0_i32, %c0_i32_0 : i32, i32
  }
  func.func @transform_4(%arg0: i32) -> (i32, i32) {
    %c0_i32 = arith.constant 0 : i32
    %c0_i32_0 = arith.constant 0 : i32
    %c0_i32_1 = arith.constant 0 : i32
    return %c0_i32, %c0_i32_0 : i32, i32
  }
  func.func @transform_5(%arg0: i32) -> (i32, i32) {
    %c0_i32 = arith.constant 0 : i32
    %c0_i32_0 = arith.constant 0 : i32
    %c0_i32_1 = arith.constant 0 : i32
    return %c0_i32, %c0_i32_0 : i32, i32
  }
  func.func @transform_6(%arg0: i32) -> (i32, i32) {
    %c0_i32 = arith.constant 0 : i32
    %c0_i32_0 = arith.constant 0 : i32
    %c0_i32_1 = arith.constant 0 : i32
    return %c0_i32, %c0_i32_0 : i32, i32
  }
  func.func @transform_7(%arg0: i32) -> (i32, i32) {
    %c0_i32 = arith.constant 0 : i32
    %c0_i32_0 = arith.constant 0 : i32
    %c0_i32_1 = arith.constant 0 : i32
    return %c0_i32, %c0_i32_0 : i32, i32
  }
  func.func @transform_8(%arg0: i32) -> (i32, i32) {
    %c0_i32 = arith.constant 0 : i32
    %c0_i32_0 = arith.constant 0 : i32
    %c0_i32_1 = arith.constant 0 : i32
    return %c0_i32, %c0_i32_0 : i32, i32
  }
  func.func @transform_9(%arg0: i32) -> (i32, i32, i32) {
    %c0_i32 = arith.constant 0 : i32
    %c0_i32_0 = arith.constant 0 : i32
    %c0_i32_1 = arith.constant 0 : i32
    return %c0_i32, %arg0, %c0_i32_0 : i32, i32, i32
  }
  func.func @transform_10(%arg0: i32) -> (i32, i32, i32) {
    %c0_i32 = arith.constant 0 : i32
    %c0_i32_0 = arith.constant 0 : i32
    %c0_i32_1 = arith.constant 0 : i32
    return %c0_i32, %arg0, %c0_i32_0 : i32, i32, i32
  }
  func.func @transform_11(%arg0: i32) -> (i32, i32, i32) {
    %c0_i32 = arith.constant 0 : i32
    %c0_i32_0 = arith.constant 0 : i32
    %c0_i32_1 = arith.constant 0 : i32
    return %c0_i32, %arg0, %c0_i32_0 : i32, i32, i32
  }
}

</mosaic_0001>

<bundles_post_ra>
// kernel: tpu_custom_call.1
= control target key start
LH: loop header
LB: loop body
LE: loop exit
PB: predicated region body
PF: predicated region fallthrough
CT: control target
= control target key end

     0   :  { %17 = vsyncpa [#allocation5], 0  ;;  %s3519_s0 = inlined_call_operand.hbm [shape: f32[8,8,16], index: 0, kind: input, shape index: {}]   ;;  %s3520_s1 = inlined_call_operand.hbm [shape: f32[16,128], index: 1, kind: input, shape index: {}]   ;;  %s3521_s2 = inlined_call_operand.vmem [shape: f32[32,128], index: 2, kind: input, shape index: {}]   ;;  %s3522_s3 = inlined_call_operand.vmem [shape: f32[1,128], index: 3, kind: input, shape index: {}]   ;;  %s3523_s4 = inlined_call_operand.hbm [shape: f32[32,128], index: 4, kind: input, shape index: {}]   ;;  %s3524_s5 = inlined_call_operand.hbm [shape: f32[32,128], index: 5, kind: input, shape index: {}]   ;;  %s3525_s6 = inlined_call_operand.vmem [shape: f32[1,128], index: 6, kind: input, shape index: {}]   ;;  %s3526_s7 = inlined_call_operand.vmem [shape: f32[32,8], index: 7, kind: input, shape index: {}]   ;;  %s3527_s8 = inlined_call_operand.vmem [shape: f32[1,8], index: 8, kind: input, shape index: {}]   ;;  %s3528_s9 = inlined_call_operand.hbm [shape: f32[8,8,8], index: 9, kind: output, shape index: {0}]   ;;  %s3529_s10 = inlined_call_operand.hbm [shape: f32[2,8,32], index: 10, kind: output, shape index: {1}]   ;;  %s3530_s11 = inlined_call_operand.hbm [shape: f32[2,8,32], index: 11, kind: output, shape index: {2}]  }
   0x1   :  { %18 = vsyncpa [#allocation8], 0 }
   0x2   :  { %19 = vsyncpa [#allocation11], 0 }
   0x3   :  { %20 = vsyncpa [#allocation6], 0 }
   0x4   :  { %21 = vsyncpa [#allocation14], 0  ;;  %s2993_s17 = smov [#allocation7]   ;;  %s2994_s19 = smov [#allocation4]  }
   0x5   :  { %s39_s18 = sshll.u32 %s2993_s17, 4  ;;  %s27_s20 = sshll.u32 %s2994_s19, 4  ;;  %s40_s18 = int_to_ptr.vmem [resolvable:$true] %s39_s18  ;;  %s28_s20 = int_to_ptr.vmem [resolvable:$true] %s27_s20 }
   0x6   :  { %s2851_s21 = scalar_lea.vmem %s40_s18, 256  ;;  %p2856_p1 = scmp.lt.s32.totalorder %s40_s18, %s40_s18 }
   0x7   :  { %p2852_p0 = scmp.ne.s32.totalorder %s40_s18, %s2851_s21  ;;  %p2857_p2 = scmp.lt.s32.totalorder %s2851_s21, %s2851_s21 }
   0x9   :  { %p2858_p3 = por %p2857_p2, %p2856_p1 }
   0xb   :  { %p2859_p4 = pnand %p2858_p3, %p2852_p0 }
   0xd   :  { %2862 = shalt.err (!%p2859_p4)
}
   0xe   :  { %s2995_s22 = smov 128   ;;  %s2996_s23 = smov 8  }
   0xf   :  { %45 = dma.hbm_to_vmem [thread:$0]  %s3520_s1, 256, %s40_s18, [#allocation8], %s2995_s22, %s2995_s22, %s2996_s23  }
  0x10   :  { %s2871_s26 = scalar_lea.vmem %s28_s20, 1024  ;;  %p2876_p6 = scmp.lt.s32.totalorder %s28_s20, %s28_s20 }
  0x11   :  { %p2872_p5 = scmp.ne.s32.totalorder %s28_s20, %s2871_s26  ;;  %p2877_p7 = scmp.lt.s32.totalorder %s2871_s26, %s2871_s26 }
  0x13   :  { %p2878_p8 = por %p2877_p7, %p2876_p6 }
  0x15   :  { %p2879_p9 = pnand %p2878_p8, %p2872_p5 }
  0x17   :  { %2882 = shalt.err (!%p2879_p9)
}
  0x18   :  { %33 = dma.hbm_to_vmem [thread:$0]  %s3519_s0, 1024, %s28_s20, [#allocation5], %s2995_s22, %s2995_s22, %s2996_s23  }
  0x19   :  { %s2997_s29 = smov [#allocation9]   ;;  %s2998_s12 = smov [#allocation10]  }
  0x1a   :  { %s55_s30 = sshll.u32 %s2997_s29, 4  ;;  %s67_s13 = sshll.u32 %s2998_s12, 4  ;;  %s56_s30 = int_to_ptr.vmem [resolvable:$true] %s55_s30  ;;  %s68_s13 = int_to_ptr.vmem [resolvable:$true] %s67_s13 }
  0x1b   :  { %s2891_s1 = scalar_lea.vmem %s56_s30, 512  ;;  %p2896_p11 = scmp.lt.s32.totalorder %s56_s30, %s56_s30 }
  0x1c   :  { %p2892_p10 = scmp.ne.s32.totalorder %s56_s30, %s2891_s1  ;;  %p2897_p12 = scmp.lt.s32.totalorder %s2891_s1, %s2891_s1 }
  0x1e   :  { %p2898_p13 = por %p2897_p12, %p2896_p11 }
  0x20   :  { %p2899_p0 = pnand %p2898_p13, %p2892_p10 }
  0x22   :  { %2902 = shalt.err (!%p2899_p0)
}
  0x23   :  { %61 = dma.hbm_to_vmem [thread:$0]  %s3523_s4, 512, %s56_s30, [#allocation8], %s2995_s22, %s2995_s22, %s2996_s23  }
  0x24   :  { %s2911_s0 = scalar_lea.vmem %s68_s13, 512  ;;  %p2916_p2 = scmp.lt.s32.totalorder %s68_s13, %s68_s13 }
  0x25   :  { %p2912_p1 = scmp.ne.s32.totalorder %s68_s13, %s2911_s0  ;;  %p2917_p3 = scmp.lt.s32.totalorder %s2911_s0, %s2911_s0 }
  0x27   :  { %p2918_p4 = por %p2917_p3, %p2916_p2 }
  0x29   :  { %p2919_p5 = pnand %p2918_p4, %p2912_p1 }
  0x2b   :  { %2922 = shalt.err (!%p2919_p5)
}
  0x2c   :  { %73 = dma.hbm_to_vmem [thread:$0]  %s3524_s5, 512, %s68_s13, [#allocation11], %s2995_s22, %s2995_s22, %s2996_s23  }
  0x2d   :  { %2983 = dma.done.wait [#allocation5], 1024  }
  0x2e   :  { %2984 = vsyncadd [#allocation5], 4294966272 }
  0x2f   :  { %2985 = dma.done.wait [#allocation8], 768  }
  0x30   :  { %2986 = vsyncadd [#allocation8], 4294966528 }
  0x31   :  { %2987 = dma.done.wait [#allocation11], 512  }
  0x32   :  { %2988 = vsyncadd [#allocation11], 4294966784  ;;  %vm113_vm0 = vcmask 130048   ;;  %v93_v0 = vld [vmem:[#allocation7 + $0x8] sm:$0xff]  ;;  %v92_v1 = vld [vmem:[#allocation7] sm:$0xff]  ;;  %v2999_v6 = vmov 0.0  }
  0x33   :  { %v103_v2 = vld [vmem:[#allocation4 + $0x20] sm:$0xff]  ;;  %2697 = vmatprep.subr.mxu1 %v93_v0  ;;  %2465 = vmatprep.subr.mxu0 %v93_v0  ;;  %v104_v3 = vld [vmem:[#allocation4 + $0x28] sm:$0xff]  ;;  %v3095_v4 = vld [vmem:[%s3521_s2 + $0x18] sm:$0xff]  ;;  %vm3000_vm1 = vmmov 0   ;;  %s3001_s27 = smov 64   ;;  %vm252_vm2 = vcmask 261120  }
  0x34   :  { %2699 = vmatpush3.msra.mxu1 %v93_v0  ;;  %2475 = vmatprep.mubr.msk.f32.mxu1 %vm113_vm0, %v103_v2  ;;  %v99_v5 = vld [vmem:[#allocation4] sm:$0xff]  ;;  %v100_v7 = vld [vmem:[#allocation4 + $0x8] sm:$0xff]  ;;  %v105_v8 = vld [vmem:[#allocation4 + $0x30] sm:$0xff]  ;;  %vm2235_vm3 = vcmask 64512   ;;  %s3004_s17 = smov [#allocation13]  }
  0x35   :  { %2698 = vmatprep.subr.mxu1 %v92_v1  ;;  %2466 = vmatpush3.msra.mxu0 %v93_v0  ;;  %v3103_v9 = vld [vmem:[%s3521_s2 + $0x10] sm:$0xff]  ;;  %v106_v10 = vld [vmem:[#allocation4 + $0x38] sm:$0xff]  ;;  %v3112_v11 = vld [vmem:[%s3521_s2 + $0x8] sm:$0xff]  ;;  %s2261_s4 = sshll.u32 %s3004_s17, 4  ;;  %s2262_s4 = int_to_ptr.vmem [resolvable:$true] %s2261_s4 }
  0x36   :  { %2700 = vmatpush3.msra.mxu1 %v92_v1  ;;  %2467 = vmatprep.subr.mxu0 %v92_v1  ;;  %v3121_v12 = vld [vmem:[%s3521_s2] sm:$0xff]  ;;  %v101_v52 = vld [vmem:[#allocation4 + $0x10] sm:$0xff]  ;;  %v102_v53 = vld [vmem:[#allocation4 + $0x18] sm:$0xff]  ;;  %s2923_s5 = scalar_lea.vmem %s2262_s4, 256  ;;  %p2928_p7 = scmp.lt.s32.totalorder %s2262_s4, %s2262_s4 }
  0x37   :  { %2476 = vmatmul.mubr.msk.f32.vlgmr.msra.gmra.mxu1 %vm113_vm0, %v104_v3  ;;  %2481 = vmatprep.subr.mxu1 %v2999_v6  ;;  %v3157_v18 = vld [vmem:[%s3522_s3] ss:$0 sm:$0xff]  ;;  %s3002_s3 = smov 32   ;;  %p2924_p6 = scmp.ne.s32.totalorder %s2262_s4, %s2923_s5 }
  0x38   :  { %2482 = vmatpush3.msra.mxu1 %v3095_v4  ;;  %2468 = vmatpush3.msra.mxu0 %v92_v1  ;;  %p2929_p8 = scmp.lt.s32.totalorder %s2923_s5, %s2923_s5 }
  0x39   :  { %2469 = vmatprep.mubr.msk.f32.mxu0 %vm113_vm0, %v99_v5  ;;  %2483 = vmatprep.subr.mxu1 %v2999_v6 }
  0x3a   :  { %2470 = vmatmul.mubr.msk.f32.vlgmr.msra.gmra.mxu0 %vm113_vm0, %v100_v7  ;;  %2478 = vmatprep.mubr.msk.f32.mxu1 %vm113_vm0, %v105_v8  ;;  %p2930_p9 = por %p2929_p8, %p2928_p7 }
  0x3b   :  { %2484 = vmatpush3.msra.mxu1 %v3103_v9  ;;  %2503 = vmatprep.subr.mxu0 %v2999_v6 }
  0x3c   :  { %2479 = vmatmul.mubr.msk.f32.gmra.mxu1 %vm113_vm0, %v106_v10  ;;  %2485 = vmatprep.subr.mxu1 %v2999_v6  ;;  %p2931_p10 = pnand %p2930_p9, %p2924_p6 }
  0x3d   :  { %2486 = vmatpush3.msra.mxu1 %v3112_v11  ;;  %2489 = vmatprep.mubr.msk.f32.mxu1 %vm3000_vm1, %v2999_v6 }
  0x3e   :  { %2487 = vmatprep.subr.mxu1 %v2999_v6  ;;  %2504 = vmatpush3.msra.mxu0 %v3095_v4 }
  0x3f   :  { %2488 = vmatpush3.msra.mxu1 %v3121_v12  ;;  %2505 = vmatprep.subr.mxu0 %v2999_v6 }
  0x40   :  { %2490 = vmatmul.mubr.f32.vlgmr.msra.gmra.mxu1 %v2999_v6  ;;  %2492 = vmatprep.subr.mxu1 %v2999_v6 }
  0x41   :  { %2493 = vmatpush3.msra.mxu1 %v3095_v4  ;;  %2500 = vmatprep.mubr.msk.f32.mxu1 %vm3000_vm1, %v2999_v6 }
  0x42   :  { %2494 = vmatprep.subr.mxu1 %v2999_v6  ;;  %2506 = vmatpush3.msra.mxu0 %v3103_v9 }
  0x43   :  { %2495 = vmatpush3.msra.mxu1 %v3103_v9  ;;  %2507 = vmatprep.subr.mxu0 %v2999_v6 }
  0x44   :  { %2496 = vmatprep.subr.mxu1 %v2999_v6  ;;  %2508 = vmatpush3.msra.mxu0 %v3112_v11 }
  0x45   :  { %2497 = vmatpush3.msra.mxu1 %v3112_v11  ;;  %2509 = vmatprep.subr.mxu0 %v2999_v6 }
  0x46   :  { %2498 = vmatprep.subr.mxu1 %v2999_v6  ;;  %2510 = vmatpush3.msra.mxu0 %v3121_v12 }
  0x47   :  { %2499 = vmatpush3.msra.mxu1 %v3121_v12  ;;  %2525 = vmatprep.subr.mxu0 %v2999_v6 }
  0x48   :  { %2514 = vmatprep.subr.mxu1 %v2999_v6  ;;  %2472 = vmatprep.mubr.msk.f32.mxu0 %vm113_vm0, %v101_v52 }
  0x49   :  { %2473 = vmatmul.mubr.msk.f32.gmra.mxu0 %vm113_vm0, %v102_v53 }
  0x4a   :  { %2511 = vmatprep.mubr.msk.f32.mxu0 %vm3000_vm1, %v2999_v6 }
  0xf7   :  { %v3148_v13 = vpop.f32.mrf.mxu1 }
  0xf9   :  { %v3150_v14 = vpop.f32.mrf.mxu1 }
  0xfa   :  { %v2471_v15 = vpop.f32.mrf.mxu0 }
  0xfb   :  { %v210_v38 = vadd.f32 %v2471_v15, %v3157_v18 }
  0xfc   :  { %v3152_v16 = vpop.f32.mrf.mxu1  ;;  %v204_v17 = vpop.f32.mrf.mxu0 }
  0xfd   :  { %v205_v20 = vadd.f32 %v3157_v18, %v204_v17 }
  0xfe   :  { %v3159_v19 = vpop.f32.mrf.mxu1 }
 0x100   :  { %v322_v21 = vpop.f32.mrf.mxu1 }
 0x101   :  { %v326_v22 = vadd.f32 %v322_v21, %v205_v20 }
 0x102   :  { %v2491_v23 = vpop.f32.mrf.mxu1 }
 0x103   :  { %2715 = vtanh.f32 %v326_v22  ;;  %v2303_v25 = vmul.f32 -1.442695, %v326_v22 }
 0x105   :  { %2717 = vpow2.f32 %v2303_v25 }
 0x109   :  { %v2474_v58 = vpop.f32.mrf.mxu0 }
 0x10b   :  { %v214_v59 = vpop.f32.mrf.mxu0 }
 0x10c   :  { %v215_v60 = vadd.f32 %v3157_v18, %v214_v59 }
 0x110   :  { %v2716_v24 = vpop.eup %2715 }
 0x111   :  { %336 = vrot.lane.b32.xlu0 %v2716_v24, %s3001_s27  ;;  %v220_v24 = vadd.f32 %v2474_v58, %v3157_v18 }
 0x112   :  { %v2718_v26 = vpop.eup %2717 }
 0x113   :  { %v330_v27 = vadd.f32 1.0, %v2718_v26 }
 0x115   :  { %2719 = vrcp.f32 %v330_v27 }
 0x122   :  { %v2720_v28 = vpop.eup %2719 }
 0x123   :  { %v334_v31 = vmul.f32 0.0, %v2720_v28 }
 0x183   :  { %v337_v29 = vpop.permute.xlu0 %336 }
 0x184   :  { %v339_v30 = vmul.f32 %v2720_v28, %v337_v29 }
 0x186   :  { %341 = vrot.lane.b32.xlu0 %v339_v30, %s3002_s3 }
 0x1f8   :  { %v342_v32 = vpop.permute.xlu0 %341 }
 0x1f9   :  { %v344_v33 = vadd.f32 %v342_v32, %v334_v31 }
 0x1fb   :  { %2721 = vtanh.f32 %v344_v33 }
 0x208   :  { %v2722_v34 = vpop.eup %2721 }
 0x209   :  { %347 = vrot.lane.b32.xlu1 %v2722_v34, %s3001_s27 }
 0x27b   :  { %v348_v35 = vpop.permute.xlu1 %347 }
 0x27c   :  { %v350_v36 = vmul.f32 %v2720_v28, %v348_v35 }
 0x27e   :  { %352 = vrot.lane.b32.xlu1 %v350_v36, %s3002_s3 }
 0x2f0   :  { %v353_v37 = vpop.permute.xlu1 %352 }
 0x2f1   :  { %355 = vst.msk [vmem:[#allocation2] sm:$0xff] %vm252_vm2, %v353_v37  ;;  %2501 = vmatmul.mubr.msk.f32.vlgmr.msra.gmra.mxu1 %vm252_vm2, %v353_v37 }
 0x2f2   :  { %2515 = vmatpush3.msra.mxu1 %v3095_v4  ;;  %2522 = vmatprep.mubr.msk.f32.mxu1 %vm3000_vm1, %v2999_v6 }
 0x2f3   :  { %2516 = vmatprep.subr.mxu1 %v2999_v6 }
 0x2f4   :  { %2517 = vmatpush3.msra.mxu1 %v3103_v9 }
 0x2f5   :  { %2518 = vmatprep.subr.mxu1 %v2999_v6 }
 0x2f6   :  { %2519 = vmatpush3.msra.mxu1 %v3112_v11 }
 0x2f7   :  { %2520 = vmatprep.subr.mxu1 %v2999_v6 }
 0x2f8   :  { %2521 = vmatpush3.msra.mxu1 %v3121_v12 }
 0x2f9   :  { %2536 = vmatprep.subr.mxu1 %v2999_v6 }
 0x3b1   :  { %v426_v39 = vpop.f32.mrf.mxu1 }
 0x3b2   :  { %v430_v40 = vadd.f32 %v426_v39, %v210_v38 }
 0x3b3   :  { %v2502_v41 = vpop.f32.mrf.mxu1 }
 0x3b4   :  { %2723 = vtanh.f32 %v430_v40  ;;  %v2305_v43 = vmul.f32 -1.442695, %v430_v40 }
 0x3b6   :  { %2725 = vpow2.f32 %v2305_v43 }
 0x3c1   :  { %v2724_v42 = vpop.eup %2723 }
 0x3c2   :  { %440 = vrot.lane.b32.xlu0 %v2724_v42, %s3001_s27  ;;  %v225_v42 = vadd.f32 %v3157_v18, %v3150_v14 }
 0x3c3   :  { %v2726_v44 = vpop.eup %2725 }
 0x3c4   :  { %v434_v45 = vadd.f32 1.0, %v2726_v44 }
 0x3c6   :  { %2727 = vrcp.f32 %v434_v45 }
 0x3d3   :  { %v2728_v46 = vpop.eup %2727 }
 0x3d4   :  { %v438_v49 = vmul.f32 %v2728_v46, %v344_v33 }
 0x434   :  { %v441_v47 = vpop.permute.xlu0 %440 }
 0x435   :  { %v443_v48 = vmul.f32 %v2728_v46, %v441_v47 }
 0x437   :  { %445 = vrot.lane.b32.xlu1 %v443_v48, %s3002_s3 }
 0x4a9   :  { %v446_v50 = vpop.permute.xlu1 %445 }
 0x4aa   :  { %v448_v51 = vadd.f32 %v446_v50, %v438_v49 }
 0x4ac   :  { %2729 = vtanh.f32 %v448_v51 }
 0x4b9   :  { %v2730_v54 = vpop.eup %2729 }
 0x4ba   :  { %451 = vrot.lane.b32.xlu0 %v2730_v54, %s3001_s27 }
 0x52c   :  { %v452_v55 = vpop.permute.xlu0 %451 }
 0x52d   :  { %v454_v56 = vmul.f32 %v2728_v46, %v452_v55 }
 0x52f   :  { %456 = vrot.lane.b32.xlu1 %v454_v56, %s3002_s3 }
 0x5a1   :  { %v457_v57 = vpop.permute.xlu1 %456 }
 0x5a2   :  { %460 = vst.msk [vmem:[#allocation2 + $0x8] sm:$0xff] %vm252_vm2, %v457_v57  ;;  %2512 = vmatmul.mubr.msk.f32.vlgmr.msra.gmra.mxu0 %vm252_vm2, %v457_v57 }
 0x5a3   :  { %2526 = vmatpush3.msra.mxu0 %v3095_v4  ;;  %2533 = vmatprep.mubr.msk.f32.mxu0 %vm3000_vm1, %v2999_v6 }
 0x5a4   :  { %2527 = vmatprep.subr.mxu0 %v2999_v6 }
 0x5a5   :  { %2528 = vmatpush3.msra.mxu0 %v3103_v9 }
 0x5a6   :  { %2529 = vmatprep.subr.mxu0 %v2999_v6 }
 0x5a7   :  { %2530 = vmatpush3.msra.mxu0 %v3112_v11 }
 0x5a8   :  { %2531 = vmatprep.subr.mxu0 %v2999_v6 }
 0x5a9   :  { %2532 = vmatpush3.msra.mxu0 %v3121_v12 }
 0x5aa   :  { %2547 = vmatprep.subr.mxu0 %v2999_v6 }
 0x662   :  { %v531_v61 = vpop.f32.mrf.mxu0 }
 0x663   :  { %v535_v62 = vadd.f32 %v531_v61, %v215_v60 }
 0x664   :  { %v2513_v63 = vpop.f32.mrf.mxu0 }
 0x665   :  { %2731 = vtanh.f32 %v535_v62  ;;  %v2307_v1 = vmul.f32 -1.442695, %v535_v62 }
 0x667   :  { %2733 = vpow2.f32 %v2307_v1 }
 0x672   :  { %v2732_v0 = vpop.eup %2731 }
 0x673   :  { %545 = vrot.lane.b32.xlu0 %v2732_v0, %s3001_s27 }
 0x674   :  { %v2734_v2 = vpop.eup %2733 }
 0x675   :  { %v539_v3 = vadd.f32 1.0, %v2734_v2 }
 0x677   :  { %2735 = vrcp.f32 %v539_v3 }
 0x684   :  { %v2736_v5 = vpop.eup %2735 }
 0x685   :  { %v543_v10 = vmul.f32 %v2736_v5, %v448_v51 }
 0x6e5   :  { %v546_v7 = vpop.permute.xlu0 %545 }
 0x6e6   :  { %v548_v8 = vmul.f32 %v2736_v5, %v546_v7 }
 0x6e8   :  { %550 = vrot.lane.b32.xlu1 %v548_v8, %s3002_s3 }
 0x75a   :  { %v551_v15 = vpop.permute.xlu1 %550 }
 0x75b   :  { %v553_v17 = vadd.f32 %v551_v15, %v543_v10 }
 0x75d   :  { %2737 = vtanh.f32 %v553_v17 }
 0x76a   :  { %v2738_v20 = vpop.eup %2737 }
 0x76b   :  { %556 = vrot.lane.b32.xlu0 %v2738_v20, %s3001_s27  ;;  %v1106_v20 = vld [vmem:[#allocation2] sm:$0xff] }
 0x7dd   :  { %v557_v21 = vpop.permute.xlu0 %556 }
 0x7de   :  { %v559_v22 = vmul.f32 %v2736_v5, %v557_v21  ;;  %v1100_v5 = vld [vmem:[#allocation9 + $0x18] sm:$0xff]  ;;  %v1098_v21 = vld [vmem:[#allocation9 + $0x8] sm:$0xff] }
 0x7e0   :  { %561 = vrot.lane.b32.xlu1 %v559_v22, %s3002_s3  ;;  %v1097_v22 = vld [vmem:[#allocation9] sm:$0xff] }
 0x852   :  { %v562_v23 = vpop.permute.xlu1 %561 }
 0x853   :  { %565 = vst.msk [vmem:[#allocation2 + $0x10] sm:$0xff] %vm252_vm2, %v562_v23  ;;  %2523 = vmatmul.mubr.msk.f32.vlgmr.msra.gmra.mxu1 %vm252_vm2, %v562_v23  ;;  %v1107_v23 = vld [vmem:[#allocation2 + $0x8] sm:$0xff] }
 0x854   :  { %2537 = vmatpush3.msra.mxu1 %v3095_v4  ;;  %2544 = vmatprep.mubr.msk.f32.mxu1 %vm3000_vm1, %v2999_v6 }
 0x855   :  { %2538 = vmatprep.subr.mxu1 %v2999_v6 }
 0x856   :  { %2539 = vmatpush3.msra.mxu1 %v3103_v9 }
 0x857   :  { %2540 = vmatprep.subr.mxu1 %v2999_v6 }
 0x858   :  { %2541 = vmatpush3.msra.mxu1 %v3112_v11 }
 0x859   :  { %2542 = vmatprep.subr.mxu1 %v2999_v6 }
 0x85a   :  { %2543 = vmatpush3.msra.mxu1 %v3121_v12 }
 0x85b   :  { %2558 = vmatprep.subr.mxu1 %v2999_v6 }
 0x913   :  { %v636_v25 = vpop.f32.mrf.mxu1 }
 0x914   :  { %v640_v26 = vadd.f32 %v636_v25, %v220_v24  ;;  %v1108_v24 = vld [vmem:[#allocation2 + $0x10] sm:$0xff] }
 0x915   :  { %v2524_v27 = vpop.f32.mrf.mxu1 }
 0x916   :  { %2739 = vtanh.f32 %v640_v26  ;;  %v2309_v29 = vmul.f32 -1.442695, %v640_v26 }
 0x918   :  { %2741 = vpow2.f32 %v2309_v29 }
 0x923   :  { %v2740_v28 = vpop.eup %2739 }
 0x924   :  { %650 = vrot.lane.b32.xlu0 %v2740_v28, %s3001_s27  ;;  %v235_v28 = vadd.f32 %v3157_v18, %v3159_v19 }
 0x925   :  { %v2742_v30 = vpop.eup %2741 }
 0x926   :  { %v644_v31 = vadd.f32 1.0, %v2742_v30 }
 0x928   :  { %2743 = vrcp.f32 %v644_v31 }
 0x935   :  { %v2744_v32 = vpop.eup %2743 }
 0x936   :  { %v648_v35 = vmul.f32 %v2744_v32, %v553_v17  ;;  %v1099_v17 = vld [vmem:[#allocation9 + $0x10] sm:$0xff] }
 0x996   :  { %v651_v33 = vpop.permute.xlu0 %650 }
 0x997   :  { %v653_v34 = vmul.f32 %v2744_v32, %v651_v33 }
 0x999   :  { %655 = vrot.lane.b32.xlu1 %v653_v34, %s3002_s3 }
 0xa0b   :  { %v656_v36 = vpop.permute.xlu1 %655 }
 0xa0c   :  { %v658_v37 = vadd.f32 %v656_v36, %v648_v35 }
 0xa0e   :  { %2745 = vtanh.f32 %v658_v37 }
 0xa1b   :  { %v2746_v38 = vpop.eup %2745 }
 0xa1c   :  { %661 = vrot.lane.b32.xlu0 %v2746_v38, %s3001_s27 }
 0xa8e   :  { %v662_v39 = vpop.permute.xlu0 %661 }
 0xa8f   :  { %v664_v40 = vmul.f32 %v2744_v32, %v662_v39 }
 0xa91   :  { %666 = vrot.lane.b32.xlu1 %v664_v40, %s3002_s3 }
 0xb03   :  { %v667_v41 = vpop.permute.xlu1 %666 }
 0xb04   :  { %670 = vst.msk [vmem:[#allocation2 + $0x18] sm:$0xff] %vm252_vm2, %v667_v41  ;;  %2534 = vmatmul.mubr.msk.f32.vlgmr.msra.gmra.mxu0 %vm252_vm2, %v667_v41 }
 0xb05   :  { %2548 = vmatpush3.msra.mxu0 %v3095_v4  ;;  %2555 = vmatprep.mubr.msk.f32.mxu0 %vm3000_vm1, %v2999_v6 }
 0xb06   :  { %2549 = vmatprep.subr.mxu0 %v2999_v6 }
 0xb07   :  { %2550 = vmatpush3.msra.mxu0 %v3103_v9 }
 0xb08   :  { %2551 = vmatprep.subr.mxu0 %v2999_v6 }
 0xb09   :  { %2552 = vmatpush3.msra.mxu0 %v3112_v11 }
 0xb0a   :  { %2553 = vmatprep.subr.mxu0 %v2999_v6 }
 0xb0b   :  { %2554 = vmatpush3.msra.mxu0 %v3121_v12  ;;  %v1109_v25 = vld [vmem:[#allocation2 + $0x18] sm:$0xff] }
 0xb0c   :  { %2569 = vmatprep.subr.mxu0 %v1100_v5 }
 0xbc4   :  { %v741_v43 = vpop.f32.mrf.mxu0 }
 0xbc5   :  { %v745_v44 = vadd.f32 %v741_v43, %v225_v42  ;;  %v3273_v42 = vld [vmem:[#allocation10 + $0x18] sm:$0xff]  ;;  %v3276_v43 = vld [vmem:[#allocation10 + $0x10] sm:$0xff] }
 0xbc6   :  { %v2535_v45 = vpop.f32.mrf.mxu0 }
 0xbc7   :  { %2747 = vtanh.f32 %v745_v44  ;;  %v2311_v47 = vmul.f32 -1.442695, %v745_v44  ;;  %v3280_v44 = vld [vmem:[#allocation10 + $0x8] sm:$0xff]  ;;  %v3284_v45 = vld [vmem:[#allocation10] sm:$0xff] }
 0xbc9   :  { %2749 = vpow2.f32 %v2311_v47 }
 0xbd4   :  { %v2748_v46 = vpop.eup %2747 }
 0xbd5   :  { %755 = vrot.lane.b32.xlu0 %v2748_v46, %s3001_s27 }
 0xbd6   :  { %v2750_v48 = vpop.eup %2749 }
 0xbd7   :  { %v749_v49 = vadd.f32 1.0, %v2750_v48 }
 0xbd9   :  { %2751 = vrcp.f32 %v749_v49 }
 0xbe6   :  { %v2752_v50 = vpop.eup %2751 }
 0xbe7   :  { %v753_v53 = vmul.f32 %v2752_v50, %v658_v37 }
 0xc47   :  { %v756_v51 = vpop.permute.xlu0 %755 }
 0xc48   :  { %v758_v52 = vmul.f32 %v2752_v50, %v756_v51 }
 0xc4a   :  { %760 = vrot.lane.b32.xlu1 %v758_v52, %s3002_s3 }
 0xcbc   :  { %v761_v54 = vpop.permute.xlu1 %760 }
 0xcbd   :  { %v763_v14 = vadd.f32 %v761_v54, %v753_v53 }
 0xcbf   :  { %2753 = vtanh.f32 %v763_v14 }
 0xccc   :  { %v2754_v55 = vpop.eup %2753 }
 0xccd   :  { %766 = vrot.lane.b32.xlu0 %v2754_v55, %s3001_s27  ;;  %v3321_v55 = vld [vmem:[%s3525_s6] ss:$0 sm:$0xff] }
 0xd3f   :  { %v767_v56 = vpop.permute.xlu0 %766 }
 0xd40   :  { %v769_v57 = vmul.f32 %v2752_v50, %v767_v56  ;;  %v240_v50 = vadd.f32 %v3152_v16, %v3157_v18 }
 0xd42   :  { %771 = vrot.lane.b32.xlu1 %v769_v57, %s3002_s3 }
 0xdb4   :  { %v772_v58 = vpop.permute.xlu1 %771 }
 0xdb5   :  { %775 = vst.msk [vmem:[#allocation2 + $0x20] sm:$0xff] %vm252_vm2, %v772_v58  ;;  %2545 = vmatmul.mubr.msk.f32.vlgmr.msra.gmra.mxu1 %vm252_vm2, %v772_v58 }
 0xdb6   :  { %2559 = vmatpush3.msra.mxu1 %v3095_v4  ;;  %2566 = vmatprep.mubr.msk.f32.mxu1 %vm3000_vm1, %v2999_v6  ;;  %v230_v4 = vadd.f32 %v3148_v13, %v3157_v18 }
 0xdb7   :  { %2560 = vmatprep.subr.mxu1 %v2999_v6 }
 0xdb8   :  { %2561 = vmatpush3.msra.mxu1 %v3103_v9 }
 0xdb9   :  { %2562 = vmatprep.subr.mxu1 %v2999_v6 }
 0xdba   :  { %2563 = vmatpush3.msra.mxu1 %v3112_v11 }
 0xdbb   :  { %2564 = vmatprep.subr.mxu1 %v2999_v6 }
 0xdbc   :  { %2565 = vmatpush3.msra.mxu1 %v3121_v12  ;;  %v1110_v26 = vld [vmem:[#allocation2 + $0x20] sm:$0xff] }
 0xdbd   :  { %2589 = vmatprep.subr.mxu1 %v2999_v6 }
 0xe75   :  { %v846_v59 = vpop.f32.mrf.mxu1 }
 0xe76   :  { %v850_v60 = vadd.f32 %v846_v59, %v230_v4 }
 0xe77   :  { %v2546_v61 = vpop.f32.mrf.mxu1 }
 0xe78   :  { %2755 = vtanh.f32 %v850_v60  ;;  %v2313_v9 = vmul.f32 -1.442695, %v850_v60 }
 0xe7a   :  { %2757 = vpow2.f32 %v2313_v9 }
 0xe85   :  { %v2756_v62 = vpop.eup %2755 }
 0xe86   :  { %860 = vrot.lane.b32.xlu0 %v2756_v62, %s3001_s27 }
 0xe87   :  { %v2758_v63 = vpop.eup %2757 }
 0xe88   :  { %v854_v11 = vadd.f32 1.0, %v2758_v63 }
 0xe8a   :  { %2759 = vrcp.f32 %v854_v11 }
 0xe97   :  { %v2760_v0 = vpop.eup %2759 }
 0xe98   :  { %v858_v2 = vmul.f32 %v2760_v0, %v763_v14 }
 0xef8   :  { %v861_v1 = vpop.permute.xlu0 %860 }
 0xef9   :  { %v863_v12 = vmul.f32 %v2760_v0, %v861_v1 }
 0xefb   :  { %865 = vrot.lane.b32.xlu1 %v863_v12, %s3002_s3 }
 0xf6d   :  { %v866_v3 = vpop.permute.xlu1 %865 }
 0xf6e   :  { %v868_v13 = vadd.f32 %v866_v3, %v858_v2 }
 0xf70   :  { %2761 = vtanh.f32 %v868_v13 }
 0xf7d   :  { %v2762_v7 = vpop.eup %2761 }
 0xf7e   :  { %871 = vrot.lane.b32.xlu0 %v2762_v7, %s3001_s27 }
 0xff0   :  { %v872_v8 = vpop.permute.xlu0 %871 }
 0xff1   :  { %v874_v10 = vmul.f32 %v2760_v0, %v872_v8 }
 0xff3   :  { %876 = vrot.lane.b32.xlu1 %v874_v10, %s3002_s3 }
0x1065   :  { %v877_v15 = vpop.permute.xlu1 %876 }
0x1066   :  { %880 = vst.msk [vmem:[#allocation2 + $0x28] sm:$0xff] %vm252_vm2, %v877_v15  ;;  %2556 = vmatmul.mubr.msk.f32.vlgmr.msra.gmra.mxu0 %vm252_vm2, %v877_v15 }
0x1067   :  { %2570 = vmatpush3.msra.mxu0 %v1100_v5  ;;  %2577 = vmatprep.mubr.msk.f32.mxu0 %vm252_vm2, %v1106_v20 }
0x1068   :  { %2571 = vmatprep.subr.mxu0 %v1099_v17 }
0x1069   :  { %2572 = vmatpush3.msra.mxu0 %v1099_v17 }
0x106a   :  { %2573 = vmatprep.subr.mxu0 %v1098_v21 }
0x106b   :  { %2574 = vmatpush3.msra.mxu0 %v1098_v21 }
0x106c   :  { %2575 = vmatprep.subr.mxu0 %v1097_v22 }
0x106d   :  { %2576 = vmatpush3.msra.mxu0 %v1097_v22  ;;  %v1111_v27 = vld [vmem:[#allocation2 + $0x28] sm:$0xff] }
0x106e   :  { %2578 = vmatmul.mubr.msk.f32.vlgmr.msra.gmra.mxu0 %vm252_vm2, %v1107_v23  ;;  %2611 = vmatprep.subr.mxu0 %v2999_v6 }
0x106f   :  { %2580 = vmatprep.mubr.msk.f32.mxu0 %vm252_vm2, %v1108_v24  ;;  %2612 = vmatpush3.msra.mxu0 %v3273_v42 }
0x1070   :  { %2613 = vmatprep.subr.mxu0 %v2999_v6 }
0x1071   :  { %2614 = vmatpush3.msra.mxu0 %v3276_v43 }
0x1072   :  { %2581 = vmatmul.mubr.msk.f32.gmra.mxu0 %vm252_vm2, %v1109_v25  ;;  %2615 = vmatprep.subr.mxu0 %v2999_v6 }
0x1073   :  { %2583 = vmatprep.mubr.msk.f32.mxu0 %vm252_vm2, %v1110_v26  ;;  %2616 = vmatpush3.msra.mxu0 %v3280_v44 }
0x1074   :  { %2617 = vmatprep.subr.mxu0 %v2999_v6 }
0x1075   :  { %2618 = vmatpush3.msra.mxu0 %v3284_v45 }
0x1076   :  { %2584 = vmatmul.mubr.msk.f32.gmra.mxu0 %vm252_vm2, %v1111_v27  ;;  %2633 = vmatprep.subr.mxu0 %v2999_v6 }
0x1126   :  { %v951_v29 = vpop.f32.mrf.mxu0 }
0x1127   :  { %v955_v30 = vadd.f32 %v951_v29, %v235_v28 }
0x1128   :  { %v2557_v31 = vpop.f32.mrf.mxu0 }
0x1129   :  { %2763 = vtanh.f32 %v955_v30  ;;  %v2315_v33 = vmul.f32 -1.442695, %v955_v30 }
0x112b   :  { %2765 = vpow2.f32 %v2315_v33 }
0x112e   :  { %v3316_v51 = vpop.f32.mrf.mxu0 }
0x112f   :  { %v1216_v26 = vadd.f32 %v3316_v51, %v3321_v55 }
0x1130   :  { %v1210_v14 = vpop.f32.mrf.mxu0 }
0x1131   :  { %v1211_v56 = vadd.f32 %v3321_v55, %v1210_v14 }
0x1136   :  { %v2764_v32 = vpop.eup %2763 }
0x1137   :  { %965 = vrot.lane.b32.xlu0 %v2764_v32, %s3001_s27 }
0x1138   :  { %v2766_v34 = vpop.eup %2765 }
0x1139   :  { %v959_v35 = vadd.f32 1.0, %v2766_v34 }
0x113b   :  { %2767 = vrcp.f32 %v959_v35 }
0x1148   :  { %v2768_v36 = vpop.eup %2767 }
0x1149   :  { %v963_v39 = vmul.f32 %v2768_v36, %v868_v13 }
0x11a9   :  { %v966_v37 = vpop.permute.xlu0 %965 }
0x11aa   :  { %v968_v38 = vmul.f32 %v2768_v36, %v966_v37 }
0x11ac   :  { %970 = vrot.lane.b32.xlu1 %v968_v38, %s3002_s3 }
0x121e   :  { %v971_v40 = vpop.permute.xlu1 %970 }
0x121f   :  { %v3269_v19 = vadd.f32 %v971_v40, %v963_v39 }
0x1221   :  { %2769 = vtanh.f32 %v3269_v19 }
0x122e   :  { %v2770_v41 = vpop.eup %2769 }
0x122f   :  { %976 = vrot.lane.b32.xlu0 %v2770_v41, %s3001_s27 }
0x12a1   :  { %v977_v46 = vpop.permute.xlu0 %976 }
0x12a2   :  { %v979_v47 = vmul.f32 %v2768_v36, %v977_v46 }
0x12a4   :  { %981 = vrot.lane.b32.xlu1 %v979_v47, %s3002_s3 }
0x1316   :  { %v982_v48 = vpop.permute.xlu1 %981 }
0x1317   :  { %985 = vst.msk [vmem:[#allocation2 + $0x30] sm:$0xff] %vm252_vm2, %v982_v48  ;;  %2567 = vmatmul.mubr.msk.f32.vlgmr.msra.gmra.mxu1 %vm252_vm2, %v982_v48 }
0x1318   :  { %2590 = vmatpush3.msra.mxu1 %v3273_v42  ;;  %2597 = vmatprep.mubr.msk.f32.mxu1 %vm3000_vm1, %v2999_v6 }
0x1319   :  { %2591 = vmatprep.subr.mxu1 %v2999_v6 }
0x131a   :  { %2592 = vmatpush3.msra.mxu1 %v3276_v43 }
0x131b   :  { %2593 = vmatprep.subr.mxu1 %v2999_v6 }
0x131c   :  { %2594 = vmatpush3.msra.mxu1 %v3280_v44 }
0x131d   :  { %2595 = vmatprep.subr.mxu1 %v2999_v6 }
0x131e   :  { %2596 = vmatpush3.msra.mxu1 %v3284_v45  ;;  %v1112_v49 = vld [vmem:[#allocation2 + $0x30] sm:$0xff] }
0x131f   :  { %2598 = vmatmul.mubr.f32.vlgmr.msra.gmra.mxu1 %v2999_v6  ;;  %2586 = vmatprep.mubr.msk.f32.mxu0 %vm252_vm2, %v1112_v49  ;;  %v2582_v49 = vpop.f32.mrf.mxu0 }
0x1320   :  { %2600 = vmatprep.subr.mxu1 %v2999_v6  ;;  %2608 = vmatprep.mubr.msk.f32.mxu1 %vm3000_vm1, %v2999_v6 }
0x1321   :  { %2601 = vmatpush3.msra.mxu1 %v3273_v42 }
0x1322   :  { %2602 = vmatprep.subr.mxu1 %v2999_v6 }
0x1323   :  { %2603 = vmatpush3.msra.mxu1 %v3276_v43 }
0x1324   :  { %2604 = vmatprep.subr.mxu1 %v2999_v6 }
0x1325   :  { %2605 = vmatpush3.msra.mxu1 %v3280_v44 }
0x1326   :  { %2606 = vmatprep.subr.mxu1 %v2999_v6 }
0x1327   :  { %2607 = vmatpush3.msra.mxu1 %v3284_v45 }
0x1328   :  { %2622 = vmatprep.subr.mxu1 %v2999_v6 }
0x13d7   :  { %v1056_v52 = vpop.f32.mrf.mxu1 }
0x13d8   :  { %v1060_v53 = vadd.f32 %v1056_v52, %v240_v50  ;;  %v1220_v50 = vpop.f32.mrf.mxu0 }
0x13d9   :  { %v2568_v54 = vpop.f32.mrf.mxu1  ;;  %v1221_v14 = vadd.f32 %v3321_v55, %v1220_v50 }
0x13da   :  { %v2317_v2 = vmul.f32 -1.442695, %v1060_v53  ;;  %v3371_v51 = vpop.f32.mrf.mxu0 }
0x13dc   :  { %v3373_v52 = vpop.f32.mrf.mxu0 }
0x13df   :  { %v1324_v57 = vpop.f32.mrf.mxu1 }
0x13e0   :  { %v1328_v58 = vadd.f32 %v1324_v57, %v1211_v56 }
0x13e1   :  { %v2599_v4 = vpop.f32.mrf.mxu1 }
0x13e2   :  { %2771 = vtanh.f32 %v1328_v58  ;;  %v2327_v16 = vmul.f32 -1.442695, %v1328_v58 }
0x13e4   :  { %2773 = vpow2.f32 %v2327_v16 }
0x13ef   :  { %v2772_v59 = vpop.eup %2771 }
0x13f0   :  { %1338 = vrot.lane.b32.xlu0 %v2772_v59, %s3001_s27 }
0x13f1   :  { %v2774_v18 = vpop.eup %2773 }
0x13f2   :  { %v1332_v60 = vadd.f32 1.0, %v2774_v18 }
0x13f4   :  { %2775 = vrcp.f32 %v1332_v60 }
0x1401   :  { %v2776_v61 = vpop.eup %2775 }
0x1402   :  { %v1336_v63 = vmul.f32 0.0, %v2776_v61 }
0x1462   :  { %v1339_v62 = vpop.permute.xlu0 %1338 }
0x1463   :  { %v1341_v9 = vmul.f32 %v2776_v61, %v1339_v62 }
0x1465   :  { %1343 = vrot.lane.b32.xlu1 %v1341_v9, %s3002_s3 }
0x14d7   :  { %v1344_v11 = vpop.permute.xlu1 %1343 }
0x14d8   :  { %v1346_v0 = vadd.f32 %v1344_v11, %v1336_v63 }
0x14da   :  { %2777 = vtanh.f32 %v1346_v0 }
0x14db   :  { %2779 = vtanh.f32 %v1060_v53 }
0x14dc   :  { %2781 = vpow2.f32 %v2317_v2 }
0x14e7   :  { %v2778_v1 = vpop.eup %2777 }
0x14e8   :  { %1349 = vrot.lane.b32.xlu0 %v2778_v1, %s3001_s27  ;;  %v2780_v12 = vpop.eup %2779 }
0x14e9   :  { %v2782_v3 = vpop.eup %2781 }
0x14ea   :  { %v1064_v13 = vadd.f32 1.0, %v2782_v3  ;;  %v1226_v3 = vadd.f32 %v2582_v49, %v3321_v55 }
0x14ec   :  { %1070 = vrot.lane.b32.xlu0 %v2780_v12, %s3001_s27  ;;  %2783 = vrcp.f32 %v1064_v13 }
0x14f9   :  { %v2784_v8 = vpop.eup %2783 }
0x14fa   :  { %v1068_v20 = vmul.f32 %v2784_v8, %v3269_v19 }
0x155a   :  { %v1350_v5 = vpop.permute.xlu0 %1349 }
0x155b   :  { %v1352_v7 = vmul.f32 %v2776_v61, %v1350_v5 }
0x155d   :  { %1354 = vrot.lane.b32.xlu1 %v1352_v7, %s3002_s3 }
0x155e   :  { %v1071_v10 = vpop.permute.xlu0 %1070 }
0x155f   :  { %v1073_v15 = vmul.f32 %v2784_v8, %v1071_v10 }
0x1561   :  { %1075 = vrot.lane.b32.xlu0 %v1073_v15, %s3002_s3 }
0x15cf   :  { %v1355_v17 = vpop.permute.xlu1 %1354 }
0x15d0   :  { %1357 = vst.msk [vmem:[#allocation2] sm:$0xff] %vm252_vm2, %v1355_v17  ;;  %2609 = vmatmul.mubr.msk.f32.vlgmr.msra.gmra.mxu1 %vm252_vm2, %v1355_v17 }
0x15d1   :  { %2623 = vmatpush3.msra.mxu1 %v3273_v42  ;;  %2630 = vmatprep.mubr.msk.f32.mxu1 %vm3000_vm1, %v2999_v6 }
0x15d2   :  { %2624 = vmatprep.subr.mxu1 %v2999_v6 }
0x15d3   :  { %v1076_v21 = vpop.permute.xlu0 %1075  ;;  %2625 = vmatpush3.msra.mxu1 %v3276_v43 }
0x15d4   :  { %v3338_v22 = vadd.f32 %v1076_v21, %v1068_v20  ;;  %2626 = vmatprep.subr.mxu1 %v2999_v6 }
0x15d5   :  { %2627 = vmatpush3.msra.mxu1 %v3280_v44 }
0x15d6   :  { %2785 = vtanh.f32 %v3338_v22  ;;  %2628 = vmatprep.subr.mxu1 %v2999_v6 }
0x15d7   :  { %2629 = vmatpush3.msra.mxu1 %v3284_v45 }
0x15d8   :  { %2644 = vmatprep.subr.mxu1 %v2999_v6 }
0x15e3   :  { %v2786_v23 = vpop.eup %2785 }
0x15e4   :  { %1081 = vrot.lane.b32.xlu0 %v2786_v23, %s3001_s27 }
0x1656   :  { %v1082_v24 = vpop.permute.xlu0 %1081 }
0x1657   :  { %v1084_v25 = vmul.f32 %v2784_v8, %v1082_v24 }
0x1659   :  { %1086 = vrot.lane.b32.xlu0 %v1084_v25, %s3002_s3 }
0x1690   :  { %v1427_v27 = vpop.f32.mrf.mxu1 }
0x1691   :  { %v1431_v28 = vadd.f32 %v1427_v27, %v1216_v26 }
0x1692   :  { %v2610_v29 = vpop.f32.mrf.mxu1 }
0x1693   :  { %2787 = vtanh.f32 %v1431_v28  ;;  %v2329_v33 = vmul.f32 -1.442695, %v1431_v28 }
0x1695   :  { %2789 = vpow2.f32 %v2329_v33 }
0x16a0   :  { %v2788_v30 = vpop.eup %2787 }
0x16a1   :  { %1441 = vrot.lane.b32.xlu1 %v2788_v30, %s3001_s27 }
0x16a2   :  { %v2790_v34 = vpop.eup %2789 }
0x16a3   :  { %v1435_v35 = vadd.f32 1.0, %v2790_v34 }
0x16a5   :  { %2791 = vrcp.f32 %v1435_v35 }
0x16b2   :  { %v2792_v36 = vpop.eup %2791 }
0x16b3   :  { %v1439_v39 = vmul.f32 %v2792_v36, %v1346_v0 }
0x16cb   :  { %v1087_v31 = vpop.permute.xlu0 %1086 }
0x16cc   :  { %1090 = vst.msk [vmem:[#allocation2 + $0x38] sm:$0xff] %vm252_vm2, %v1087_v31  ;;  %1091 = vst.msk [vmem:[#allocation13] sm:$0xff] %vm252_vm2, %v1087_v31  ;;  %v1231_v31 = vadd.f32 %v3321_v55, %v3373_v52 }
0x16d3   :  { %v1113_v32 = vld [vmem:[#allocation2 + $0x38] sm:$0xff] }
0x16d4   :  { %2587 = vmatmul.mubr.msk.f32.gmra.mxu0 %vm252_vm2, %v1113_v32 }
0x16d5   :  { %2619 = vmatprep.mubr.msk.f32.mxu0 %vm3000_vm1, %v2999_v6 }
0x1713   :  { %v1442_v37 = vpop.permute.xlu1 %1441 }
0x1714   :  { %v1444_v38 = vmul.f32 %v2792_v36, %v1442_v37 }
0x1716   :  { %1446 = vrot.lane.b32.xlu1 %v1444_v38, %s3002_s3 }
0x1788   :  { %v1447_v40 = vpop.permute.xlu1 %1446 }
0x1789   :  { %v1449_v19 = vadd.f32 %v1447_v40, %v1439_v39 }
0x178b   :  { %2793 = vtanh.f32 %v1449_v19 }
0x1794   :  { %v3375_v53 = vpop.f32.mrf.mxu0 }
0x1796   :  { %v3377_v54 = vpop.f32.mrf.mxu0 }
0x1798   :  { %v2794_v41 = vpop.eup %2793 }
0x1799   :  { %1452 = vrot.lane.b32.xlu1 %v2794_v41, %s3001_s27 }
0x180b   :  { %v1453_v46 = vpop.permute.xlu1 %1452 }
0x180c   :  { %v1455_v47 = vmul.f32 %v2792_v36, %v1453_v46 }
0x180e   :  { %1457 = vrot.lane.b32.xlu1 %v1455_v47, %s3002_s3 }
0x1880   :  { %v1458_v48 = vpop.permute.xlu1 %1457 }
0x1881   :  { %1460 = vst.msk [vmem:[#allocation2 + $0x8] sm:$0xff] %vm252_vm2, %v1458_v48  ;;  %2620 = vmatmul.mubr.msk.f32.vlgmr.msra.gmra.mxu0 %vm252_vm2, %v1458_v48 }
0x1882   :  { %2634 = vmatpush3.msra.mxu0 %v3273_v42  ;;  %2641 = vmatprep.mubr.msk.f32.mxu0 %vm3000_vm1, %v2999_v6 }
0x1883   :  { %2635 = vmatprep.subr.mxu0 %v2999_v6 }
0x1884   :  { %2636 = vmatpush3.msra.mxu0 %v3276_v43 }
0x1885   :  { %2637 = vmatprep.subr.mxu0 %v2999_v6 }
0x1886   :  { %2638 = vmatpush3.msra.mxu0 %v3280_v44 }
0x1887   :  { %2639 = vmatprep.subr.mxu0 %v2999_v6 }
0x1888   :  { %2640 = vmatpush3.msra.mxu0 %v3284_v45 }
0x1889   :  { %2655 = vmatprep.subr.mxu0 %v2999_v6 }
0x1941   :  { %v1530_v56 = vpop.f32.mrf.mxu0 }
0x1942   :  { %v1534_v57 = vadd.f32 %v1530_v56, %v1221_v14  ;;  %v1236_v14 = vadd.f32 %v3371_v51, %v3321_v55 }
0x1943   :  { %v2621_v58 = vpop.f32.mrf.mxu0 }
0x1944   :  { %2795 = vtanh.f32 %v1534_v57  ;;  %v2331_v59 = vmul.f32 -1.442695, %v1534_v57 }
0x1946   :  { %2797 = vpow2.f32 %v2331_v59 }
0x1951   :  { %v2796_v4 = vpop.eup %2795 }
0x1952   :  { %1544 = vrot.lane.b32.xlu0 %v2796_v4, %s3001_s27 }
0x1953   :  { %v2798_v16 = vpop.eup %2797 }
0x1954   :  { %v1538_v18 = vadd.f32 1.0, %v2798_v16 }
0x1956   :  { %2799 = vrcp.f32 %v1538_v18 }
0x1963   :  { %v2800_v60 = vpop.eup %2799 }
0x1964   :  { %v1542_v9 = vmul.f32 %v2800_v60, %v1449_v19 }
0x19c4   :  { %v1545_v61 = vpop.permute.xlu0 %1544 }
0x19c5   :  { %v1547_v62 = vmul.f32 %v2800_v60, %v1545_v61 }
0x19c7   :  { %1549 = vrot.lane.b32.xlu1 %v1547_v62, %s3002_s3 }
0x1a39   :  { %v1550_v63 = vpop.permute.xlu1 %1549 }
0x1a3a   :  { %v1552_v11 = vadd.f32 %v1550_v63, %v1542_v9 }
0x1a3c   :  { %2801 = vtanh.f32 %v1552_v11 }
0x1a49   :  { %v2802_v0 = vpop.eup %2801 }
0x1a4a   :  { %1555 = vrot.lane.b32.xlu0 %v2802_v0, %s3001_s27  ;;  %v2087_v0 = vld [vmem:[#allocation2] sm:$0xff] }
0x1abc   :  { %v1556_v1 = vpop.permute.xlu0 %1555 }
0x1abd   :  { %v1558_v12 = vmul.f32 %v2800_v60, %v1556_v1  ;;  %v2098_v60 = vld [vmem:[%s3526_s7 + $0x18] sm:$0xff]  ;;  %v2096_v1 = vld [vmem:[%s3526_s7 + $0x8] sm:$0xff] }
0x1abf   :  { %1560 = vrot.lane.b32.xlu1 %v1558_v12, %s3002_s3  ;;  %v2095_v12 = vld [vmem:[%s3526_s7] sm:$0xff] }
0x1b31   :  { %v1561_v2 = vpop.permute.xlu1 %1560 }
0x1b32   :  { %1563 = vst.msk [vmem:[#allocation2 + $0x10] sm:$0xff] %vm252_vm2, %v1561_v2  ;;  %2631 = vmatmul.mubr.msk.f32.vlgmr.msra.gmra.mxu1 %vm252_vm2, %v1561_v2  ;;  %v2088_v2 = vld [vmem:[#allocation2 + $0x8] sm:$0xff] }
0x1b33   :  { %2645 = vmatpush3.msra.mxu1 %v3273_v42  ;;  %2652 = vmatprep.mubr.msk.f32.mxu1 %vm3000_vm1, %v2999_v6 }
0x1b34   :  { %2646 = vmatprep.subr.mxu1 %v2999_v6 }
0x1b35   :  { %2647 = vmatpush3.msra.mxu1 %v3276_v43 }
0x1b36   :  { %2648 = vmatprep.subr.mxu1 %v2999_v6 }
0x1b37   :  { %2649 = vmatpush3.msra.mxu1 %v3280_v44 }
0x1b38   :  { %2650 = vmatprep.subr.mxu1 %v2999_v6 }
0x1b39   :  { %2651 = vmatpush3.msra.mxu1 %v3284_v45 }
0x1b3a   :  { %2666 = vmatprep.subr.mxu1 %v2999_v6 }
0x1bf2   :  { %v1633_v13 = vpop.f32.mrf.mxu1 }
0x1bf3   :  { %v1637_v5 = vadd.f32 %v1633_v13, %v1226_v3  ;;  %v2089_v3 = vld [vmem:[#allocation2 + $0x10] sm:$0xff] }
0x1bf4   :  { %v2632_v7 = vpop.f32.mrf.mxu1 }
0x1bf5   :  { %2803 = vtanh.f32 %v1637_v5  ;;  %v2333_v10 = vmul.f32 -1.442695, %v1637_v5 }
0x1bf7   :  { %2805 = vpow2.f32 %v2333_v10 }
0x1c02   :  { %v2804_v8 = vpop.eup %2803 }
0x1c03   :  { %1647 = vrot.lane.b32.xlu0 %v2804_v8, %s3001_s27  ;;  %v1241_v8 = vadd.f32 %v3321_v55, %v3377_v54 }
0x1c04   :  { %v2806_v15 = vpop.eup %2805 }
0x1c05   :  { %v1641_v17 = vadd.f32 1.0, %v2806_v15 }
0x1c07   :  { %2807 = vrcp.f32 %v1641_v17 }
0x1c14   :  { %v2808_v20 = vpop.eup %2807 }
0x1c15   :  { %v1645_v24 = vmul.f32 %v2808_v20, %v1552_v11  ;;  %v2097_v11 = vld [vmem:[%s3526_s7 + $0x10] sm:$0xff] }
0x1c75   :  { %v1648_v21 = vpop.permute.xlu0 %1647 }
0x1c76   :  { %v1650_v23 = vmul.f32 %v2808_v20, %v1648_v21 }
0x1c78   :  { %1652 = vrot.lane.b32.xlu1 %v1650_v23, %s3002_s3 }
0x1cea   :  { %v1653_v25 = vpop.permute.xlu1 %1652 }
0x1ceb   :  { %v1655_v26 = vadd.f32 %v1653_v25, %v1645_v24 }
0x1ced   :  { %2809 = vtanh.f32 %v1655_v26 }
0x1cfa   :  { %v2810_v27 = vpop.eup %2809 }
0x1cfb   :  { %1658 = vrot.lane.b32.xlu0 %v2810_v27, %s3001_s27 }
0x1d6d   :  { %v1659_v28 = vpop.permute.xlu0 %1658 }
0x1d6e   :  { %v1661_v29 = vmul.f32 %v2808_v20, %v1659_v28  ;;  %v3463_v20 = vld [vmem:[%s3527_s8] ss:$0 sm:$0xff]  ;;  %s3003_s8 = smov 96  }
0x1d70   :  { %1663 = vrot.lane.b32.xlu1 %v1661_v29, %s3002_s3 }
0x1de2   :  { %v1664_v30 = vpop.permute.xlu1 %1663 }
0x1de3   :  { %1666 = vst.msk [vmem:[#allocation2 + $0x18] sm:$0xff] %vm252_vm2, %v1664_v30  ;;  %2642 = vmatmul.mubr.msk.f32.vlgmr.msra.gmra.mxu0 %vm252_vm2, %v1664_v30 }
0x1de4   :  { %2656 = vmatpush3.msra.mxu0 %v3273_v42  ;;  %2663 = vmatprep.mubr.msk.f32.mxu0 %vm3000_vm1, %v2999_v6 }
0x1de5   :  { %2657 = vmatprep.subr.mxu0 %v2999_v6 }
0x1de6   :  { %2658 = vmatpush3.msra.mxu0 %v3276_v43 }
0x1de7   :  { %2659 = vmatprep.subr.mxu0 %v2999_v6 }
0x1de8   :  { %2660 = vmatpush3.msra.mxu0 %v3280_v44 }
0x1de9   :  { %2661 = vmatprep.subr.mxu0 %v2999_v6 }
0x1dea   :  { %2662 = vmatpush3.msra.mxu0 %v3284_v45  ;;  %v2090_v13 = vld [vmem:[#allocation2 + $0x18] sm:$0xff] }
0x1deb   :  { %2677 = vmatprep.subr.mxu0 %v2098_v60 }
0x1ea3   :  { %v1736_v32 = vpop.f32.mrf.mxu0 }
0x1ea4   :  { %v1740_v33 = vadd.f32 %v1736_v32, %v1231_v31 }
0x1ea5   :  { %v2643_v34 = vpop.f32.mrf.mxu0 }
0x1ea6   :  { %2811 = vtanh.f32 %v1740_v33  ;;  %v2335_v36 = vmul.f32 -1.442695, %v1740_v33 }
0x1ea8   :  { %2813 = vpow2.f32 %v2335_v36 }
0x1eb3   :  { %v2812_v35 = vpop.eup %2811 }
0x1eb4   :  { %1750 = vrot.lane.b32.xlu0 %v2812_v35, %s3001_s27 }
0x1eb5   :  { %v2814_v37 = vpop.eup %2813 }
0x1eb6   :  { %v1744_v38 = vadd.f32 1.0, %v2814_v37 }
0x1eb8   :  { %2815 = vrcp.f32 %v1744_v38 }
0x1ec5   :  { %v2816_v39 = vpop.eup %2815 }
0x1ec6   :  { %v1748_v41 = vmul.f32 %v2816_v39, %v1655_v26 }
0x1f26   :  { %v1751_v40 = vpop.permute.xlu0 %1750 }
0x1f27   :  { %v1753_v19 = vmul.f32 %v2816_v39, %v1751_v40 }
0x1f29   :  { %1755 = vrot.lane.b32.xlu1 %v1753_v19, %s3002_s3 }
0x1f9b   :  { %v1756_v46 = vpop.permute.xlu1 %1755 }
0x1f9c   :  { %v1758_v47 = vadd.f32 %v1756_v46, %v1748_v41 }
0x1f9e   :  { %2817 = vtanh.f32 %v1758_v47 }
0x1fab   :  { %v2818_v48 = vpop.eup %2817 }
0x1fac   :  { %1761 = vrot.lane.b32.xlu0 %v2818_v48, %s3001_s27 }
0x201e   :  { %v1762_v49 = vpop.permute.xlu0 %1761 }
0x201f   :  { %v1764_v50 = vmul.f32 %v2816_v39, %v1762_v49 }
0x2021   :  { %1766 = vrot.lane.b32.xlu1 %v1764_v50, %s3002_s3 }
0x2093   :  { %v1767_v52 = vpop.permute.xlu1 %1766 }
0x2094   :  { %1769 = vst.msk [vmem:[#allocation2 + $0x20] sm:$0xff] %vm252_vm2, %v1767_v52  ;;  %2653 = vmatmul.mubr.msk.f32.vlgmr.msra.gmra.mxu1 %vm252_vm2, %v1767_v52  ;;  %v1246_v52 = vadd.f32 %v3375_v53, %v3321_v55 }
0x2095   :  { %2667 = vmatpush3.msra.mxu1 %v3273_v42  ;;  %2674 = vmatprep.mubr.msk.f32.mxu1 %vm3000_vm1, %v2999_v6 }
0x2096   :  { %2668 = vmatprep.subr.mxu1 %v2999_v6 }
0x2097   :  { %2669 = vmatpush3.msra.mxu1 %v3276_v43 }
0x2098   :  { %2670 = vmatprep.subr.mxu1 %v2999_v6 }
0x2099   :  { %2671 = vmatpush3.msra.mxu1 %v3280_v44 }
0x209a   :  { %2672 = vmatprep.subr.mxu1 %v2999_v6 }
0x209b   :  { %2673 = vmatpush3.msra.mxu1 %v3284_v45  ;;  %v2091_v5 = vld [vmem:[#allocation2 + $0x20] sm:$0xff] }
0x2154   :  { %v1839_v56 = vpop.f32.mrf.mxu1 }
0x2155   :  { %v1843_v42 = vadd.f32 %v1839_v56, %v1236_v14 }
0x2156   :  { %v2654_v57 = vpop.f32.mrf.mxu1 }
0x2157   :  { %2819 = vtanh.f32 %v1843_v42  ;;  %v2337_v4 = vmul.f32 -1.442695, %v1843_v42 }
0x2159   :  { %2821 = vpow2.f32 %v2337_v4 }
0x2164   :  { %v2820_v58 = vpop.eup %2819 }
0x2165   :  { %1853 = vrot.lane.b32.xlu0 %v2820_v58, %s3001_s27 }
0x2166   :  { %v2822_v43 = vpop.eup %2821 }
0x2167   :  { %v1847_v59 = vadd.f32 1.0, %v2822_v43 }
0x2169   :  { %2823 = vrcp.f32 %v1847_v59 }
0x2176   :  { %v2824_v44 = vpop.eup %2823 }
0x2177   :  { %v1851_v45 = vmul.f32 %v2824_v44, %v1758_v47 }
0x21d7   :  { %v1854_v16 = vpop.permute.xlu0 %1853 }
0x21d8   :  { %v1856_v6 = vmul.f32 %v2824_v44, %v1854_v16 }
0x21da   :  { %1858 = vrot.lane.b32.xlu1 %v1856_v6, %s3002_s3 }
0x224c   :  { %v1859_v18 = vpop.permute.xlu1 %1858 }
0x224d   :  { %v3433_v51 = vadd.f32 %v1859_v18, %v1851_v45 }
0x224f   :  { %2825 = vtanh.f32 %v3433_v51 }
0x225c   :  { %v2826_v61 = vpop.eup %2825 }
0x225d   :  { %1864 = vrot.lane.b32.xlu0 %v2826_v61, %s3001_s27 }
0x22cf   :  { %v1865_v62 = vpop.permute.xlu0 %1864 }
0x22d0   :  { %v1867_v9 = vmul.f32 %v2824_v44, %v1865_v62 }
0x22d2   :  { %1869 = vrot.lane.b32.xlu1 %v1867_v9, %s3002_s3 }
0x2344   :  { %v1870_v63 = vpop.permute.xlu1 %1869 }
0x2345   :  { %1872 = vst.msk [vmem:[#allocation2 + $0x28] sm:$0xff] %vm252_vm2, %v1870_v63  ;;  %2664 = vmatmul.mubr.msk.f32.vlgmr.msra.gmra.mxu0 %vm252_vm2, %v1870_v63 }
0x2346   :  { %2678 = vmatpush3.msra.mxu0 %v2098_v60  ;;  %2685 = vmatprep.mubr.msk.f32.mxu0 %vm252_vm2, %v2087_v0 }
0x2347   :  { %2679 = vmatprep.subr.mxu0 %v2097_v11 }
0x2348   :  { %2680 = vmatpush3.msra.mxu0 %v2097_v11 }
0x2349   :  { %2681 = vmatprep.subr.mxu0 %v2096_v1 }
0x234a   :  { %2682 = vmatpush3.msra.mxu0 %v2096_v1 }
0x234b   :  { %2683 = vmatprep.subr.mxu0 %v2095_v12 }
0x234c   :  { %2684 = vmatpush3.msra.mxu0 %v2095_v12  ;;  %v2092_v7 = vld [vmem:[#allocation2 + $0x28] sm:$0xff] }
0x234d   :  { %2686 = vmatmul.mubr.msk.f32.vlgmr.msra.gmra.mxu0 %vm252_vm2, %v2088_v2 }
0x234e   :  { %2688 = vmatprep.mubr.msk.f32.mxu0 %vm252_vm2, %v2089_v3 }
0x2351   :  { %2689 = vmatmul.mubr.msk.f32.gmra.mxu0 %vm252_vm2, %v2090_v13 }
0x2352   :  { %2691 = vmatprep.mubr.msk.f32.mxu0 %vm252_vm2, %v2091_v5 }
0x2355   :  { %2692 = vmatmul.mubr.msk.f32.gmra.mxu0 %vm252_vm2, %v2092_v7 }
0x2405   :  { %v1942_v10 = vpop.f32.mrf.mxu0 }
0x2406   :  { %v1946_v15 = vadd.f32 %v1942_v10, %v1241_v8 }
0x2407   :  { %v2665_v17 = vpop.f32.mrf.mxu0 }
0x2408   :  { %2827 = vtanh.f32 %v1946_v15  ;;  %v2339_v34 = vmul.f32 -1.442695, %v1946_v15 }
0x240a   :  { %2829 = vpow2.f32 %v2339_v34 }
0x240d   :  { %v2687_v21 = vpop.f32.mrf.mxu0 }
0x240e   :  { %v2202_v23 = vadd.f32 %v2687_v21, %v3463_v20 }
0x240f   :  { %v2196_v24 = vpop.f32.mrf.mxu0 }
0x2410   :  { %2237 = vst.msk [vmem:[#allocation12 + $0x8] sm:$0xff] %vm2235_vm3, %v2202_v23  ;;  %v2197_v25 = vadd.f32 %v3463_v20, %v2196_v24 }
0x2411   :  { %v2690_v26 = vpop.f32.mrf.mxu0 }
0x2412   :  { %2236 = vst.msk [vmem:[#allocation12] sm:$0xff] %vm2235_vm3, %v2197_v25  ;;  %v2212_v54 = vadd.f32 %v2690_v26, %v3463_v20 }
0x2413   :  { %v2206_v27 = vpop.f32.mrf.mxu0 }
0x2414   :  { %2239 = vst.msk [vmem:[#allocation12 + $0x18] sm:$0xff] %vm2235_vm3, %v2212_v54  ;;  %v2207_v28 = vadd.f32 %v3463_v20, %v2206_v27 }
0x2415   :  { %v2828_v29 = vpop.eup %2827  ;;  %v2693_v30 = vpop.f32.mrf.mxu0 }
0x2416   :  { %2238 = vst.msk [vmem:[#allocation12 + $0x10] sm:$0xff] %vm2235_vm3, %v2207_v28  ;;  %v2222_v31 = vadd.f32 %v2693_v30, %v3463_v20  ;;  %1956 = vrot.lane.b32.xlu0 %v2828_v29, %s3001_s27 }
0x2417   :  { %v2216_v32 = vpop.f32.mrf.mxu0  ;;  %v2830_v35 = vpop.eup %2829 }
0x2418   :  { %2241 = vst.msk [vmem:[#allocation12 + $0x28] sm:$0xff] %vm2235_vm3, %v2222_v31  ;;  %v2217_v33 = vadd.f32 %v3463_v20, %v2216_v32  ;;  %v1950_v36 = vadd.f32 1.0, %v2830_v35 }
0x241a   :  { %2240 = vst.msk [vmem:[#allocation12 + $0x20] sm:$0xff] %vm2235_vm3, %v2217_v33  ;;  %2831 = vrcp.f32 %v1950_v36 }
0x2427   :  { %v2832_v37 = vpop.eup %2831 }
0x2428   :  { %v1954_v40 = vmul.f32 %v2832_v37, %v3433_v51 }
0x2488   :  { %v1957_v38 = vpop.permute.xlu0 %1956 }
0x2489   :  { %v1959_v39 = vmul.f32 %v2832_v37, %v1957_v38 }
0x248b   :  { %1961 = vrot.lane.b32.xlu1 %v1959_v39, %s3002_s3 }
0x24fd   :  { %v1962_v19 = vpop.permute.xlu1 %1961 }
0x24fe   :  { %v1964_v41 = vadd.f32 %v1962_v19, %v1954_v40 }
0x2500   :  { %2833 = vtanh.f32 %v1964_v41 }
0x250d   :  { %v2834_v46 = vpop.eup %2833 }
0x250e   :  { %1967 = vrot.lane.b32.xlu0 %v2834_v46, %s3001_s27 }
0x2580   :  { %v1968_v47 = vpop.permute.xlu0 %1967 }
0x2581   :  { %v1970_v48 = vmul.f32 %v2832_v37, %v1968_v47 }
0x2583   :  { %1972 = vrot.lane.b32.xlu1 %v1970_v48, %s3002_s3 }
0x25f5   :  { %v1973_v49 = vpop.permute.xlu1 %1972 }
0x25f6   :  { %1975 = vst.msk [vmem:[#allocation2 + $0x30] sm:$0xff] %vm252_vm2, %v1973_v49  ;;  %2675 = vmatmul.mubr.msk.f32.vlgmr.msra.gmra.mxu1 %vm252_vm2, %v1973_v49 }
0x25fd   :  { %v2093_v50 = vld [vmem:[#allocation2 + $0x30] sm:$0xff] }
0x25fe   :  { %2694 = vmatprep.mubr.msk.f32.mxu0 %vm252_vm2, %v2093_v50 }
0x26b6   :  { %v2045_v14 = vpop.f32.mrf.mxu1 }
0x26b7   :  { %v2049_v56 = vadd.f32 %v2045_v14, %v1246_v52 }
0x26b8   :  { %v2676_v42 = vpop.f32.mrf.mxu1 }
0x26b9   :  { %2835 = vtanh.f32 %v2049_v56  ;;  %v2341_v58 = vmul.f32 -1.442695, %v2049_v56 }
0x26bb   :  { %2837 = vpow2.f32 %v2341_v58 }
0x26c6   :  { %v2836_v57 = vpop.eup %2835 }
0x26c7   :  { %2059 = vrot.lane.b32.xlu0 %v2836_v57, %s3001_s27 }
0x26c8   :  { %v2838_v4 = vpop.eup %2837 }
0x26c9   :  { %v2053_v43 = vadd.f32 1.0, %v2838_v4 }
0x26cb   :  { %2839 = vrcp.f32 %v2053_v43 }
0x26d8   :  { %v2840_v59 = vpop.eup %2839 }
0x26d9   :  { %v2057_v6 = vmul.f32 %v2840_v59, %v1964_v41 }
0x2739   :  { %v2060_v44 = vpop.permute.xlu0 %2059 }
0x273a   :  { %v2062_v16 = vmul.f32 %v2840_v59, %v2060_v44 }
0x273c   :  { %2064 = vrot.lane.b32.xlu1 %v2062_v16, %s3002_s3 }
0x27ae   :  { %v2065_v45 = vpop.permute.xlu1 %2064 }
0x27af   :  { %v2067_v55 = vadd.f32 %v2065_v45, %v2057_v6 }
0x27b1   :  { %2841 = vtanh.f32 %v2067_v55 }
0x27be   :  { %v2842_v53 = vpop.eup %2841 }
0x27bf   :  { %2070 = vrot.lane.b32.xlu0 %v2842_v53, %s3001_s27 }
0x27c3   :  { %1093 = vrot.lane.b32.xlu0 %v3338_v22, %s3003_s8 }
0x2831   :  { %v2071_v18 = vpop.permute.xlu0 %2070 }
0x2832   :  { %v2073_v51 = vmul.f32 %v2840_v59, %v2071_v18 }
0x2834   :  { %2075 = vrot.lane.b32.xlu1 %v2073_v51, %s3002_s3 }
0x2835   :  { %v1094_v60 = vpop.permute.xlu0 %1093 }
0x2836   :  { %1096 = vst.msk [vmem:[#allocation15] sm:$0xff] %vm252_vm2, %v1094_v60 }
0x2838   :  { %2082 = vrot.lane.b32.xlu1 %v2067_v55, %s3003_s8 }
0x28a6   :  { %v2076_v61 = vpop.permute.xlu1 %2075 }
0x28a7   :  { %2078 = vst.msk [vmem:[#allocation2 + $0x38] sm:$0xff] %vm252_vm2, %v2076_v61  ;;  %2080 = vst.msk [vmem:[#allocation13 + $0x8] sm:$0xff] %vm252_vm2, %v2076_v61 }
0x28aa   :  { %v2083_v62 = vpop.permute.xlu1 %2082 }
0x28ab   :  { %2086 = vst.msk [vmem:[#allocation15 + $0x8] sm:$0xff] %vm252_vm2, %v2083_v62 }
0x28ae   :  { %v2094_v9 = vld [vmem:[#allocation2 + $0x38] sm:$0xff] }
0x28af   :  { %2695 = vmatmul.mubr.msk.f32.gmra.mxu0 %vm252_vm2, %v2094_v9 }
0x28b0   :  { %2934 = shalt.err (!%p2931_p10)
}
0x28b1   :  { %2267 = dma.vmem_to_hbm [thread:$0]  %s2262_s4, 256, %s3529_s10, [#allocation14], %s2995_s22, %s2995_s22, %s2996_s23  }
0x28b2   :  { %s3005_s20 = smov [#allocation15]  }
0x28b3   :  { %s2273_s21 = sshll.u32 %s3005_s20, 4  ;;  %s2274_s21 = int_to_ptr.vmem [resolvable:$true] %s2273_s21 }
0x28b4   :  { %s2943_s24 = scalar_lea.vmem %s2274_s21, 256  ;;  %p2948_p12 = scmp.lt.s32.totalorder %s2274_s21, %s2274_s21 }
0x28b5   :  { %p2944_p11 = scmp.ne.s32.totalorder %s2274_s21, %s2943_s24  ;;  %p2949_p13 = scmp.lt.s32.totalorder %s2943_s24, %s2943_s24 }
0x28b7   :  { %p2950_p0 = por %p2949_p13, %p2948_p12 }
0x28b9   :  { %p2951_p1 = pnand %p2950_p0, %p2944_p11 }
0x28bb   :  { %2954 = shalt.err (!%p2951_p1)
}
0x28bc   :  { %2279 = dma.vmem_to_hbm [thread:$0]  %s2274_s21, 256, %s3530_s11, [#allocation14], %s2995_s22, %s2995_s22, %s2996_s23  }
0x28bd   :  { %s3006_s26 = smov [#allocation12]  }
0x28be   :  { %s2249_s10 = sshll.u32 %s3006_s26, 4  ;;  %s2250_s10 = int_to_ptr.vmem [resolvable:$true] %s2249_s10 }
0x28bf   :  { %s2963_s27 = scalar_lea.vmem %s2250_s10, 1024  ;;  %p2968_p3 = scmp.lt.s32.totalorder %s2250_s10, %s2250_s10 }
0x28c0   :  { %p2964_p2 = scmp.ne.s32.totalorder %s2250_s10, %s2963_s27  ;;  %p2969_p4 = scmp.lt.s32.totalorder %s2963_s27, %s2963_s27 }
0x28c2   :  { %p2970_p5 = por %p2969_p4, %p2968_p3 }
0x28c4   :  { %p2971_p6 = pnand %p2970_p5, %p2964_p2 }
0x296f   :  { %v2696_v22 = vpop.f32.mrf.mxu0 }
0x2970   :  { %v2232_v63 = vadd.f32 %v2696_v22, %v3463_v20 }
0x2971   :  { %v2226_v11 = vpop.f32.mrf.mxu0 }
0x2972   :  { %2243 = vst.msk [vmem:[#allocation12 + $0x38] sm:$0xff] %vm2235_vm3, %v2232_v63  ;;  %v2227_v0 = vadd.f32 %v3463_v20, %v2226_v11 }
0x2974   :  { %2242 = vst.msk [vmem:[#allocation12 + $0x30] sm:$0xff] %vm2235_vm3, %v2227_v0 }
0x2975   :  { %2974 = shalt.err (!%p2971_p6)
}
0x2976   :  { %2255 = dma.vmem_to_hbm [thread:$0]  %s2250_s10, 1024, %s3528_s9, [#allocation6], %s2995_s22, %s2995_s22, %s2996_s23  }
0x2977   :  { %2989 = dma.done.wait [#allocation6], 1024  }
0x2978   :  { %2990 = vsyncadd [#allocation6], 4294966272 }
0x2979   :  { %2991 = dma.done.wait [#allocation14], 512  }
0x297a   :  { %2992 = vsyncadd [#allocation14], 4294966784 }
0x297b   :  { %2289 = vsyncpa [#allocation5], 1 }
0x297c   :  { %2290 = vsyncpa [#allocation8], 1 }
0x297d   :  { %2291 = vsyncpa [#allocation11], 1 }
0x297e   :  { %2292 = vsyncpa [#allocation6], 1 }
0x297f   :  { %2293 = vsyncpa [#allocation14], 1 }

</bundles_post_ra>
